<compile_context>
chip_gen: v7x
topology: tpu7x:2x2x1
jax: 0.10.0
libtpu: 0.0.40
codegen_flags: <defaults>
</compile_context>

<pallas_src>
import functools

import jax
import jax.numpy as jnp
from jax import lax
from jax.experimental import pallas as pl
from jax.experimental.pallas import tpu as pltpu


# ----------------------------------------------------------------------------
# Pallas kernel: per-plane folded matmuls -> ReLU -> head matmul -> sigma/rgb
# ----------------------------------------------------------------------------
def _mlp_decoder_kernel(*refs, n_parts, c):
    # refs = [x_0 .. x_{n_parts-1}, w1, b1, w2t, b2, out]
    #   x_p    : (TP, C)  per-plane gathered features (stream dtype)
    #   w1_ref : (K, H)   K = n_parts*C, folded first-layer weights (stream dtype)
    #   b1_ref : (1, H)   f32
    #   w2t_ref: (O, H)   f32, second layer stored (out, in)
    #   b2_ref : (O, 1)   f32
    #   out_ref: (O, TP)  f32, row 0 = raw sigma, rows 1.. = activated rgb
    x_refs = refs[:n_parts]
    w1_ref, b1_ref, w2t_ref, b2_ref, out_ref = refs[n_parts:]

    # first layer: accumulate per-plane partial matmuls in f32 on the MXU
    h = jnp.dot(x_refs[0][...], w1_ref[0:c, :],
                preferred_element_type=jnp.float32)                # (TP, H)
    for p in range(1, n_parts):
        h = h + jnp.dot(x_refs[p][...], w1_ref[p * c:(p + 1) * c, :],
                        preferred_element_type=jnp.float32)
    h = jnp.maximum(h + b1_ref[...], 0.0)                          # ReLU (f32)

    # second layer, emitted transposed so the store is lane-dense along TP.
    # NOTE(perf): if a bundle dump ever shows an XLU transpose of `h` here,
    # switch to pl.dot(w2t_ref[...], h, trans_b=True).
    out_t = lax.dot_general(w2t_ref[...], h,
                            dimension_numbers=(((1,), (1,)), ((), ())),
                            preferred_element_type=jnp.float32)    # (O, TP)
    out_t = out_t + b2_ref[...]
    act = jax.nn.sigmoid(out_t) * (1.0 + 2 * 0.001) - 0.001
    row = lax.broadcasted_iota(jnp.int32, out_t.shape, 0)
    # one lane-dense store per tile (last dim = tile_p, a multiple of 128)
    out_ref[...] = jnp.where(row == 0, out_t, act)


def _round_up(x, m):
    return (x + m - 1) // m * m


def _pick_tile(p, max_tile, min_tile=512):
    """Point-dim tile: big (HBM roofline), P is padded UP to it (never shrink
    the tile to a divisor of P)."""
    p128 = _round_up(p, 128)
    if p128 <= max_tile:
        return p128                       # whole problem in a single grid step
    tile = max_tile
    # prefer >= 4 grid steps (>= 2 per v7x TensorCore) but never go below 512
    # rows, where the ~0.35us per-step overhead starts to dominate.
    while tile > min_tile and _round_up(p128, tile) // tile < 4:
        tile //= 2
    return tile


def mlp_decoder_pallas(parts, w1_eff, b1, w2t, b2t, *, tile_p=None,
                       compute_dtype=jnp.bfloat16):
    """parts: list of n_parts (P, C) per-plane feature arrays,
    w1_eff: (n_parts*C, H) folded first-layer weights, b1: (1, H),
    w2t: (O, H), b2t: (O, 1).
    Returns (O, P) f32: row 0 = raw sigma, rows 1.. = activated rgb."""
    n_parts = len(parts)
    P, C = parts[0].shape
    K, H = w1_eff.shape
    assert K == n_parts * C
    O = w2t.shape[0]

    stream_dt = jnp.dtype(compute_dtype)
    if tile_p is None:
        max_tile = 8192 if stream_dt.itemsize <= 2 else 4096
        tile_p = _pick_tile(P, max_tile)
    assert tile_p % 128 == 0
    # pad the point dim UP to the tile; tail rows are zero and sliced off below
    P_pad = _round_up(P, tile_p)

    def prep(x):
        x = x.astype(compute_dtype)
        if P_pad != P:
            x = jnp.pad(x, ((0, P_pad - P), (0, 0)))
        return x

    parts = [prep(x) for x in parts]
    # big streams in the (bf16 by default) stream dtype; everything touching
    # the f32 accumulator stays f32.
    w1_eff = w1_eff.astype(compute_dtype)
    b1 = b1.astype(jnp.float32)
    w2t = w2t.astype(jnp.float32)
    b2t = b2t.astype(jnp.float32)

    # rough VMEM footprint (double-buffered streams + f32 intermediates); only
    # raise the scoped-VMEM limit when we actually need more than ~12 MiB
    # (matters for v5e's 16 MiB default with huge f32 tiles).
    vmem_est = (2 * n_parts * tile_p * C * stream_dt.itemsize   # x streams x2
                + 4 * O * tile_p * 4                            # out x2 + temps
                + 2 * (K * H * stream_dt.itemsize + (H + O * H + O) * 4)
                + tile_p * H * 4)                               # h accumulator
    vmem_limit = None
    if vmem_est > 12 * 1024 * 1024:
        vmem_limit = int(1.25 * vmem_est) + (4 << 20)

    kernel = functools.partial(_mlp_decoder_kernel, n_parts=n_parts, c=C)
    in_specs = (
        # NOTE: add pipeline_mode=pl.Buffered(3) on these streams only if a
        # profile shows exposed DMA after the tile-size / bf16 changes.
        [pl.BlockSpec((tile_p, C), lambda i: (i, 0)) for _ in range(n_parts)]
        + [pl.BlockSpec((K, H), lambda i: (0, 0)),
           pl.BlockSpec((1, H), lambda i: (0, 0)),
           pl.BlockSpec((O, H), lambda i: (0, 0)),
           pl.BlockSpec((O, 1), lambda i: (0, 0))])

    out = pl.pallas_call(
        kernel,
        out_shape=jax.ShapeDtypeStruct((O, P_pad), jnp.float32),
        grid_spec=pltpu.PrefetchScalarGridSpec(
            num_scalar_prefetch=0,
            grid=(P_pad // tile_p,),
            in_specs=in_specs,
            out_specs=pl.BlockSpec((O, tile_p), lambda i: (0, i)),
        ),
        compiler_params=pltpu.CompilerParams(
            dimension_semantics=("parallel",),
            vmem_limit_bytes=vmem_limit),
    )(*parts, w1_eff, b1, w2t, b2t)
    return out[:, :P]


# ----------------------------------------------------------------------------
# Plain-JAX glue: tri-plane projection + bilinear grid_sample (zeros padding,
# align_corners=False), reproducing EG3D's sample_from_planes, channel-last /
# point-major so no plane-major transpose of the big point stream is needed.
# ----------------------------------------------------------------------------
def generate_plane_axes():
    return jnp.array([[[1, 0, 0], [0, 1, 0], [0, 0, 1]],
                      [[1, 0, 0], [0, 0, 1], [0, 1, 0]],
                      [[0, 0, 1], [1, 0, 0], [0, 1, 0]]], dtype=jnp.float32)


def _project_onto_planes(plane_axes, coordinates, box_warp):
    coords = (2.0 / box_warp) * coordinates                          # (B, M, 3)
    inv_axes = jnp.linalg.inv(plane_axes)                            # (3, 3, 3)
    return jnp.einsum("bmi,pij->bpmj", coords, inv_axes)[..., :2]    # (B, 3, M, 2)


def _grid_sample_bilinear_cl(feat_cl, grid):
    # feat_cl: (N, H, W, C) channel-last; grid: (N, M, 2) in [-1, 1]
    N, H, W, C = feat_cl.shape
    gx, gy = grid[..., 0], grid[..., 1]
    ix = ((gx + 1.0) * W - 1.0) / 2.0
    iy = ((gy + 1.0) * H - 1.0) / 2.0
    ix0 = jnp.floor(ix)
    iy0 = jnp.floor(iy)
    ix1, iy1 = ix0 + 1.0, iy0 + 1.0
    wx1, wy1 = ix - ix0, iy - iy0
    wx0, wy0 = 1.0 - wx1, 1.0 - wy1
    feat_flat = feat_cl.reshape(N, H * W, C)

    def gather(iy_, ix_):
        valid = ((ix_ >= 0) & (ix_ <= W - 1) & (iy_ >= 0) & (iy_ <= H - 1))
        ixc = jnp.clip(ix_, 0, W - 1).astype(jnp.int32)
        iyc = jnp.clip(iy_, 0, H - 1).astype(jnp.int32)
        idx = iyc * W + ixc                                           # (N, M)
        g = jnp.take_along_axis(feat_flat, idx[..., None], axis=1)    # (N, M, C)
        return g * valid[..., None].astype(feat_cl.dtype)

    v00 = gather(iy0, ix0)
    v01 = gather(iy0, ix1)
    v10 = gather(iy1, ix0)
    v11 = gather(iy1, ix1)
    return (v00 * (wy0 * wx0)[..., None] + v01 * (wy0 * wx1)[..., None] +
            v10 * (wy1 * wx0)[..., None] + v11 * (wy1 * wx1)[..., None])


def sample_planes_pointmajor(plane_axes, plane_features, coordinates, box_warp):
    """Returns a list of n_planes arrays of shape (B, M, C), channel-last."""
    B, n_planes, C, H, W = plane_features.shape
    M = coordinates.shape[1]
    proj = _project_onto_planes(plane_axes, coordinates, box_warp)    # (B,3,M,2)
    feat_cl = jnp.transpose(plane_features, (0, 1, 3, 4, 2))          # (B,3,H,W,C)
    feat_cl = feat_cl.reshape(B * n_planes, H, W, C)
    grid = proj.reshape(B * n_planes, M, 2)
    sampled = _grid_sample_bilinear_cl(feat_cl, grid)                 # (B*3,M,C)
    sampled = sampled.reshape(B, n_planes, M, C)
    return [sampled[:, p] for p in range(n_planes)]


# ----------------------------------------------------------------------------
# Full MLPDecoder.forward
# ----------------------------------------------------------------------------
def mlp_decoder_forward(points, planes, params, shape, subsample=None,
                        compute_dtype=jnp.bfloat16, tile_p=None):
    batch_size, num_rays, samples_per_ray, _ = shape
    plane_axes, box_warp, plane_features = planes[:3]
    B, n_planes, C, _, _ = plane_features.shape
    M = points.shape[1]
    P = B * M

    w1, b1, w2, b2 = params              # w1 (C,H), b1 (1,H), w2 (H,O), b2 (1,O)
    O = w2.shape[1]
    assert O >= 2, "output_dim must be >= 1 (sigma + at least one rgb channel)"

    # per-plane features, point-major / channel-last; cast to the stream dtype
    # HERE (before any HBM materialization) so the big streams stay half-width.
    sampled = sample_planes_pointmajor(plane_axes, plane_features, points,
                                       box_warp)
    parts = [s.reshape(P, C).astype(compute_dtype) for s in sampled]
    w1_blocks = [w1 / float(n_planes)] * n_planes        # folds the plane mean

    if len(planes) == 4:
        uf = planes[-1]                                  # (B, C, h, w)
        Bu, Cu, hu, wu = uf.shape
        uf = jnp.transpose(uf, (0, 2, 3, 1)).reshape(Bu, hu * wu, Cu)
        if subsample is not None:
            uf = jnp.take_along_axis(uf, subsample[..., 0][..., None], axis=1)
        uf = uf.astype(compute_dtype)                    # cast before broadcast
        uf = jnp.broadcast_to(uf[:, :, None, :],
                              (Bu, uf.shape[1], samples_per_ray, Cu))
        parts.append(uf.reshape(P, Cu))                  # (P, C)
        w1_blocks.append(w1 * 0.01)                      # folds the 0.01 scale
    # (no 4th plane -> only 3 feature streams, nothing extra is streamed)

    w1_eff = jnp.concatenate(w1_blocks, axis=0)          # (K, H), tiny

    out = mlp_decoder_pallas(parts, w1_eff, b1, w2.T, b2.reshape(O, 1),
                             tile_p=tile_p, compute_dtype=compute_dtype)  # (O, P)

    sigma = out[0].reshape(batch_size, num_rays, samples_per_ray, 1)
    rgb = jnp.transpose(out[1:], (1, 0)).reshape(
        batch_size, num_rays, samples_per_ray, O - 1)
    return sigma, rgb


# ----------------------------------------------------------------------------
# Pure-JAX reference (independent NCHW grid_sample path + unfused MLP)
# ----------------------------------------------------------------------------
def _grid_sample_bilinear_nchw(feat, grid):
    N, C, H, W = feat.shape
    gx, gy = grid[..., 0], grid[..., 1]
    ix = ((gx + 1.0) * W - 1.0) / 2.0
    iy = ((gy + 1.0) * H - 1.0) / 2.0
    ix0 = jnp.floor(ix)
    iy0 = jnp.floor(iy)
    ix1, iy1 = ix0 + 1.0, iy0 + 1.0
    wx1, wy1 = ix - ix0, iy - iy0
    wx0, wy0 = 1.0 - wx1, 1.0 - wy1

    def gather(iy_, ix_):
        valid = ((ix_ >= 0) & (ix_ <= W - 1) & (iy_ >= 0) & (iy_ <= H - 1))
        ixc = jnp.clip(ix_, 0, W - 1).astype(jnp.int32)
        iyc = jnp.clip(iy_, 0, H - 1).astype(jnp.int32)
        g = jax.vmap(lambda f, yy, xx: f[:, yy, xx])(feat, iyc, ixc)  # (N, C, M)
        return g * valid[:, None, :].astype(feat.dtype)

    v00 = gather(iy0, ix0)
    v01 = gather(iy0, ix1)
    v10 = gather(iy1, ix0)
    v11 = gather(iy1, ix1)
    return (v00 * (wy0 * wx0)[:, None, :] + v01 * (wy0 * wx1)[:, None, :] +
            v10 * (wy1 * wx0)[:, None, :] + v11 * (wy1 * wx1)[:, None, :])


def reference_forward(points, planes, shape, params, subsample=None):
    batch_size, num_rays, samples_per_ray, _ = shape
    plane_axes, box_warp, plane_features = planes[:3]
    B, n_planes, C, H, W = plane_features.shape
    M = points.shape[1]
    proj = _project_onto_planes(plane_axes, points, box_warp)
    feat = plane_features.reshape(B * n_planes, C, H, W)
    grid = proj.reshape(B * n_planes, M, 2)
    sampled = _grid_sample_bilinear_nchw(feat, grid)                  # (B*3, C, M)
    x = jnp.transpose(sampled, (0, 2, 1)).reshape(B, n_planes, M, C)
    x = x.mean(1).reshape(-1, C)
    if len(planes) == 4:
        uf = planes[-1]
        Bu, Cu, hu, wu = uf.shape
        uf = jnp.transpose(uf, (0, 2, 3, 1)).reshape(Bu, hu * wu, Cu)
        if subsample is not None:
            uf = jnp.take_along_axis(uf, subsample[..., 0][..., None], axis=1)
        uf = jnp.broadcast_to(uf[:, :, None, :],
                              (Bu, uf.shape[1], samples_per_ray, Cu)).reshape(-1, Cu)
        x = x + uf * 0.01
    w1, b1, w2, b2 = params
    h = jnp.maximum(jnp.dot(x, w1, precision=lax.Precision.HIGHEST) + b1, 0.0)
    out = jnp.dot(h, w2, precision=lax.Precision.HIGHEST) + b2
    sigma = out[:, 0:1].reshape(batch_size, num_rays, samples_per_ray, 1)
    rgb = (jax.nn.sigmoid(out[:, 1:]) * (1.0 + 2 * 0.001) - 0.001
           ).reshape(batch_size, num_rays, samples_per_ray, -1)
    return sigma, rgb


def init_params(key, input_dim, hidden_dim, output_dim):
    # PyTorch nn.Linear stores W as (out, in); we keep (in, out) here.
    k1, k2, k3, k4 = jax.random.split(key, 4)
    lim1 = 1.0 / jnp.sqrt(input_dim)
    lim2 = 1.0 / jnp.sqrt(hidden_dim)
    w1 = jax.random.uniform(k1, (input_dim, hidden_dim), jnp.float32, -lim1, lim1)
    b1 = jax.random.uniform(k2, (1, hidden_dim), jnp.float32, -lim1, lim1)
    w2 = jax.random.uniform(k3, (hidden_dim, 1 + output_dim), jnp.float32, -lim2, lim2)
    b2 = jax.random.uniform(k4, (1, 1 + output_dim), jnp.float32, -lim2, lim2)
    return w1, b1, w2, b2


if __name__ == "__main__":
    key = jax.random.PRNGKey(0)
    kp, kf, ku, kw = jax.random.split(key, 4)

    # small shapes consistent with the forward contract
    batch_size, num_rays, samples_per_ray = 2, 8, 8
    input_dim, hidden_dim, output_dim = 32, 64, 3
    Hp = Wp = 16
    M = num_rays * samples_per_ray                       # points per batch
    shape = (batch_size, num_rays, samples_per_ray, 3)

    points = jax.random.uniform(kp, (batch_size, M, 3), jnp.float32, -0.4, 0.4)
    plane_features = jax.random.normal(
        kf, (batch_size, 3, input_dim, Hp, Wp), jnp.float32) * 0.5
    # optional 4th plane: per-ray features, (B, C, h, w) with h*w == num_rays
    ray_features = jax.random.normal(ku, (batch_size, input_dim, 2, 4), jnp.float32)
    plane_axes = generate_plane_axes()
    box_warp = 1.0
    planes4 = (plane_axes, box_warp, plane_features, ray_features)
    planes3 = (plane_axes, box_warp, plane_features)

    params = init_params(kw, input_dim, hidden_dim, output_dim)

    fwd_bf16 = jax.jit(functools.partial(mlp_decoder_forward, shape=shape))
    fwd_f32 = jax.jit(functools.partial(mlp_decoder_forward, shape=shape,
                                        compute_dtype=jnp.float32))

    sigma_ref, rgb_ref = reference_forward(points, planes4, shape, params)
    sigma3_ref, rgb3_ref = reference_forward(points, planes3, shape, params)

    # --- default bf16 streams, with the optional 4th plane (4 feature streams)
    sigma, rgb = fwd_bf16(points, planes4, params)
    jax.block_until_ready((sigma, rgb))
    assert sigma.shape == (batch_size, num_rays, samples_per_ray, 1)
    assert rgb.shape == (batch_size, num_rays, samples_per_ray, output_dim)
    assert jnp.allclose(sigma, sigma_ref, atol=5e-2, rtol=5e-2)
    assert jnp.allclose(rgb, rgb_ref, atol=5e-2, rtol=5e-2)

    # --- default bf16 streams, no 4th plane (3 feature streams)
    sigma3, rgb3 = fwd_bf16(points, planes3, params)
    jax.block_until_ready((sigma3, rgb3))
    assert jnp.allclose(sigma3, sigma3_ref, atol=5e-2, rtol=5e-2)
    assert jnp.allclose(rgb3, rgb3_ref, atol=5e-2, rtol=5e-2)

    # --- f32 streams (tighter numerics), both plane configs
    sigma_f, rgb_f = fwd_f32(points, planes4, params)
    jax.block_until_ready((sigma_f, rgb_f))
    assert jnp.allclose(sigma_f, sigma_ref, atol=2e-3, rtol=2e-3)
    assert jnp.allclose(rgb_f, rgb_ref, atol=2e-3, rtol=2e-3)

    sigma3_f, rgb3_f = fwd_f32(points, planes3, params)
    jax.block_until_ready((sigma3_f, rgb3_f))
    assert jnp.allclose(sigma3_f, sigma3_ref, atol=2e-3, rtol=2e-3)
    assert jnp.allclose(rgb3_f, rgb3_ref, atol=2e-3, rtol=2e-3)

    # TODO(synk): optional fp8(e4m3) stream path for v7x (halves HBM traffic
    # again vs bf16) is not implemented; gate behind a quality check.
    print("KERNEL_OK")
</pallas_src>

<mosaic_0001>
module attributes {stable_mosaic.version = 11 : i64} {
  func.func @_mlp_decoder_kernel(%arg0: i32, %arg1: memref<128x32xbf16, #tpu.memory_space<vmem>>, %arg2: memref<128x32xbf16, #tpu.memory_space<vmem>>, %arg3: memref<128x32xbf16, #tpu.memory_space<vmem>>, %arg4: memref<128x32xbf16, #tpu.memory_space<vmem>>, %arg5: memref<128x64xbf16, #tpu.memory_space<vmem>>, %arg6: memref<1x64xf32, #tpu.memory_space<vmem>>, %arg7: memref<4x64xf32, #tpu.memory_space<vmem>>, %arg8: memref<4x1xf32, #tpu.memory_space<vmem>>, %arg9: memref<4x128xf32, #tpu.memory_space<vmem>>) attributes {dimension_semantics = [#tpu.dimension_semantics<parallel>], iteration_bounds = array<i64: 1>, scalar_prefetch = 0 : i64, scratch_operands = 0 : i64, tpu.core_type = #tpu.core_type<tc>, window_params = [{transform_indices = @transform_0, window_bounds = array<i64: 128, 32>}, {transform_indices = @transform_1, window_bounds = array<i64: 128, 32>}, {transform_indices = @transform_2, window_bounds = array<i64: 128, 32>}, {transform_indices = @transform_3, window_bounds = array<i64: 128, 32>}, {pipeline_mode = #tpu.pipeline_mode<synchronous>, transform_indices = @transform_4, window_bounds = array<i64: 128, 64>}, {pipeline_mode = #tpu.pipeline_mode<synchronous>, transform_indices = @transform_5, window_bounds = array<i64: 1, 64>}, {pipeline_mode = #tpu.pipeline_mode<synchronous>, transform_indices = @transform_6, window_bounds = array<i64: 4, 64>}, {pipeline_mode = #tpu.pipeline_mode<synchronous>, transform_indices = @transform_7, window_bounds = array<i64: 4, 1>}, {transform_indices = @transform_8, window_bounds = array<i64: 4, 128>}]} {
    %c0 = arith.constant 0 : index
    %c0_0 = arith.constant 0 : index
    %0 = vector.load %arg1[%c0, %c0_0] : memref<128x32xbf16, #tpu.memory_space<vmem>>, vector<128x32xbf16>
    %c0_1 = arith.constant 0 : index
    %c0_2 = arith.constant 0 : index
    %1 = vector.load %arg5[%c0_1, %c0_2] : memref<128x64xbf16, #tpu.memory_space<vmem>>, vector<32x64xbf16>
    %cst = arith.constant dense<0.000000e+00> : vector<128x64xf32>
    %2 = tpu.matmul %0, %1, %cst {dimension_numbers = #tpu.dot_dimension_numbers<[1], [0], [0], [1], [0, 0, 1, 1], [], []>} : vector<128x32xbf16>, vector<32x64xbf16>, vector<128x64xf32> -> vector<128x64xf32>
    %c0_3 = arith.constant 0 : index
    %c0_4 = arith.constant 0 : index
    %3 = vector.load %arg2[%c0_3, %c0_4] : memref<128x32xbf16, #tpu.memory_space<vmem>>, vector<128x32xbf16>
    %c32 = arith.constant 32 : index
    %c0_5 = arith.constant 0 : index
    %4 = vector.load %arg5[%c32, %c0_5] : memref<128x64xbf16, #tpu.memory_space<vmem>>, vector<32x64xbf16>
    %cst_6 = arith.constant dense<0.000000e+00> : vector<128x64xf32>
    %5 = tpu.matmul %3, %4, %cst_6 {dimension_numbers = #tpu.dot_dimension_numbers<[1], [0], [0], [1], [0, 0, 1, 1], [], []>} : vector<128x32xbf16>, vector<32x64xbf16>, vector<128x64xf32> -> vector<128x64xf32>
    %6 = arith.addf %2, %5 : vector<128x64xf32>
    %c0_7 = arith.constant 0 : index
    %c0_8 = arith.constant 0 : index
    %7 = vector.load %arg3[%c0_7, %c0_8] : memref<128x32xbf16, #tpu.memory_space<vmem>>, vector<128x32xbf16>
    %c64 = arith.constant 64 : index
    %c0_9 = arith.constant 0 : index
    %8 = vector.load %arg5[%c64, %c0_9] : memref<128x64xbf16, #tpu.memory_space<vmem>>, vector<32x64xbf16>
    %cst_10 = arith.constant dense<0.000000e+00> : vector<128x64xf32>
    %9 = tpu.matmul %7, %8, %cst_10 {dimension_numbers = #tpu.dot_dimension_numbers<[1], [0], [0], [1], [0, 0, 1, 1], [], []>} : vector<128x32xbf16>, vector<32x64xbf16>, vector<128x64xf32> -> vector<128x64xf32>
    %10 = arith.addf %6, %9 : vector<128x64xf32>
    %c0_11 = arith.constant 0 : index
    %c0_12 = arith.constant 0 : index
    %11 = vector.load %arg4[%c0_11, %c0_12] : memref<128x32xbf16, #tpu.memory_space<vmem>>, vector<128x32xbf16>
    %c96 = arith.constant 96 : index
    %c0_13 = arith.constant 0 : index
    %12 = vector.load %arg5[%c96, %c0_13] : memref<128x64xbf16, #tpu.memory_space<vmem>>, vector<32x64xbf16>
    %cst_14 = arith.constant dense<0.000000e+00> : vector<128x64xf32>
    %13 = tpu.matmul %11, %12, %cst_14 {dimension_numbers = #tpu.dot_dimension_numbers<[1], [0], [0], [1], [0, 0, 1, 1], [], []>} : vector<128x32xbf16>, vector<32x64xbf16>, vector<128x64xf32> -> vector<128x64xf32>
    %14 = arith.addf %10, %13 : vector<128x64xf32>
    %c0_15 = arith.constant 0 : index
    %c0_16 = arith.constant 0 : index
    %15 = vector.load %arg6[%c0_15, %c0_16] : memref<1x64xf32, #tpu.memory_space<vmem>>, vector<1x64xf32>
    %16 = vector.broadcast %15 : vector<1x64xf32> to vector<128x64xf32>
    %17 = arith.addf %14, %16 : vector<128x64xf32>
    %cst_17 = arith.constant 0.000000e+00 : f32
    %18 = vector.broadcast %cst_17 : f32 to vector<128x64xf32>
    %19 = arith.maximumf %17, %18 : vector<128x64xf32>
    %c0_18 = arith.constant 0 : index
    %c0_19 = arith.constant 0 : index
    %20 = vector.load %arg7[%c0_18, %c0_19] : memref<4x64xf32, #tpu.memory_space<vmem>>, vector<4x64xf32>
    %cst_20 = arith.constant dense<0.000000e+00> : vector<4x128xf32>
    %21 = tpu.matmul %20, %19, %cst_20 {dimension_numbers = #tpu.dot_dimension_numbers<[1], [1], [0], [0], [0, 0, 1, 0], [], []>} : vector<4x64xf32>, vector<128x64xf32>, vector<4x128xf32> -> vector<4x128xf32>
    %c0_21 = arith.constant 0 : index
    %c0_22 = arith.constant 0 : index
    %22 = vector.load %arg8[%c0_21, %c0_22] : memref<4x1xf32, #tpu.memory_space<vmem>>, vector<4x1xf32>
    %23 = vector.broadcast %22 : vector<4x1xf32> to vector<4x128xf32>
    %24 = arith.addf %21, %23 : vector<4x128xf32>
    %25 = arith.negf %24 : vector<4x128xf32>
    %26 = math.exp %25 : vector<4x128xf32>
    %cst_23 = arith.constant 1.000000e+00 : f32
    %27 = vector.broadcast %cst_23 : f32 to vector<4x128xf32>
    %28 = arith.addf %27, %26 : vector<4x128xf32>
    %29 = arith.divf %27, %28 : vector<4x128xf32>
    %cst_24 = arith.constant 1.002000e+00 : f32
    %30 = vector.broadcast %cst_24 : f32 to vector<4x128xf32>
    %31 = arith.mulf %29, %30 : vector<4x128xf32>
    %cst_25 = arith.constant 1.000000e-03 : f32
    %32 = vector.broadcast %cst_25 : f32 to vector<4x128xf32>
    %33 = arith.subf %31, %32 : vector<4x128xf32>
    %34 = tpu.iota {dimensions = array<i32: 0>} : vector<4x128xi32>
    %c0_i32 = arith.constant 0 : i32
    %35 = vector.broadcast %c0_i32 : i32 to vector<4x128xi32>
    %36 = arith.cmpi eq, %34, %35 : vector<4x128xi32>
    %37 = arith.select %36, %24, %33 : vector<4x128xi1>, vector<4x128xf32>
    %c0_26 = arith.constant 0 : index
    %c0_27 = arith.constant 0 : index
    %38 = vector.load %arg9[%c0_26, %c0_27] : memref<4x128xf32, #tpu.memory_space<vmem>>, vector<4x128xf32>
    tpu.vector_store %arg9[%c0_26, %c0_27], %37 {strides = array<i32>} : memref<4x128xf32, #tpu.memory_space<vmem>>, vector<4x128xf32>,
    return
  }
  func.func @transform_0(%arg0: i32) -> (i32, i32) {
    %c0_i32 = arith.constant 0 : i32
    %c0_i32_0 = arith.constant 0 : i32
    return %arg0, %c0_i32 : i32, i32
  }
  func.func @transform_1(%arg0: i32) -> (i32, i32) {
    %c0_i32 = arith.constant 0 : i32
    %c0_i32_0 = arith.constant 0 : i32
    return %arg0, %c0_i32 : i32, i32
  }
  func.func @transform_2(%arg0: i32) -> (i32, i32) {
    %c0_i32 = arith.constant 0 : i32
    %c0_i32_0 = arith.constant 0 : i32
    return %arg0, %c0_i32 : i32, i32
  }
  func.func @transform_3(%arg0: i32) -> (i32, i32) {
    %c0_i32 = arith.constant 0 : i32
    %c0_i32_0 = arith.constant 0 : i32
    return %arg0, %c0_i32 : i32, i32
  }
  func.func @transform_4(%arg0: i32) -> (i32, i32) {
    %c0_i32 = arith.constant 0 : i32
    %c0_i32_0 = arith.constant 0 : i32
    %c0_i32_1 = arith.constant 0 : i32
    return %c0_i32, %c0_i32_0 : i32, i32
  }
  func.func @transform_5(%arg0: i32) -> (i32, i32) {
    %c0_i32 = arith.constant 0 : i32
    %c0_i32_0 = arith.constant 0 : i32
    %c0_i32_1 = arith.constant 0 : i32
    return %c0_i32, %c0_i32_0 : i32, i32
  }
  func.func @transform_6(%arg0: i32) -> (i32, i32) {
    %c0_i32 = arith.constant 0 : i32
    %c0_i32_0 = arith.constant 0 : i32
    %c0_i32_1 = arith.constant 0 : i32
    return %c0_i32, %c0_i32_0 : i32, i32
  }
  func.func @transform_7(%arg0: i32) -> (i32, i32) {
    %c0_i32 = arith.constant 0 : i32
    %c0_i32_0 = arith.constant 0 : i32
    %c0_i32_1 = arith.constant 0 : i32
    return %c0_i32, %c0_i32_0 : i32, i32
  }
  func.func @transform_8(%arg0: i32) -> (i32, i32) {
    %c0_i32 = arith.constant 0 : i32
    %c0_i32_0 = arith.constant 0 : i32
    return %c0_i32, %arg0 : i32, i32
  }
}

</mosaic_0001>

<bundles_post_ra>
// kernel: custom-call.11
= control target key start
LH: loop header
LB: loop body
LE: loop exit
PB: predicated region body
PF: predicated region fallthrough
CT: control target
= control target key end

     0   :  { %5 = vsyncpa [#allocation2], 0  ;;  %s942_s0 = inlined_call_operand.hbm [shape: f32[3,3,3], index: 0, kind: input, shape index: {}]   ;;  %s943_s1 = inlined_call_operand.vmem [shape: f32[3,3,3], index: 1, kind: output, shape index: {0}]   ;;  %s944_s2 = inlined_call_operand.hbm [shape: s32[3,3], index: 2, kind: output, shape index: {1}]   ;;  %s945_s3 = inlined_call_operand.vmem [shape: s32[3,3], index: 3, kind: output, shape index: {2}]  }
   0x1   :  { %7 = vsyncpa [#allocation2 + $0x1], 0 }
   0x2   :  { %8 = vsyncpa [#allocation3], 0 }
   0x3   :  { %10 = vsyncpa [#allocation3 + $0x1], 0  ;;  %s735_s12 = smov 0   ;;  %s737_s13 = smov 0  }
   0x4   :  { %s739_s14 = smov 0   ;;  %s741_s15 = smov 0  }
   0x5 LB: > { %s756_s16 = sadd.s32 4294967295, %s706_s15   ;;  %s536_s17 = sadd.s32 4294967294, %s706_s15   ;;  %s706_s15 = sphi %s741_s15, %s956_s15   ;;  %s702_s14 = sphi %s739_s14, %s955_s14   ;;  %s698_s13 = sphi %s737_s13, %s954_s13   ;;  %s694_s12 = sphi %s735_s12, %s953_s12  }
   0x6   : > { %s760_s18 = sadd.s32 1, %s706_s15   ;;  %s20_s19 = sshrl.u32 %s706_s15, 3 }
   0x7   : > { %s21_s20 = sshrl.u32 %s760_s18, 3  ;;  %s25_s21 = sadd.s32 1, %s702_s14 }
   0x8   : > { %s22_s22 = ssub.s32 %s20_s19, %s21_s20  ;;  %p35_p0 = scmp.ne.s32.totalorder %s702_s14, %s698_s13 }
   0x9   : > { %p23_p1 = scmp.eq.s32.totalorder %s22_s22, 0  ;;  %p36_p2 = scmp.eq.s32.totalorder %s756_s16, 2 }
   0xa   : > { %p41_p3 = scmp.ne.s32.totalorder %s698_s13, %s694_s12  ;;  %p42_p4 = scmp.eq.s32.totalorder %s536_s17, 2 }
   0xb   : > { %s771_s23 = scalar_select %p23_p1, %s702_s14, %s25_s21  }
   0xc   : > { %p773_p5 = por %p36_p2, %p35_p0  ;;  %p777_p6 = por %p42_p4, %p41_p3 }
   0xd   : > { %p565_p7 = scmp.lt.s32.totalorder %s706_s15, 3  ;;  %s87_s26 = sand.u32 1, %s706_s15  }
   0xe   : > { %s948_s25 = scalar_select %p777_p6, 1, 0 }
   0xf   : > { %s540_s27 = sshll.u32 %s706_s15, 6  ;;  %s539_s28 = sshll.u32 %s87_s26, 2 }
  0x10   : > { %s787_s4 = scalar_lea.hbm %s942_s0, %s540_s27  ;;  %s91_s5 = scalar_lea.vmem [#allocation1], %s539_s28 }
  0x11   : > { %s98_s6 = sshll.u32 %s91_s5, 4  ;;  %s88_s7 = scalar_lea.sflag [#allocation2], %s87_s26  ;;  %s790_s6 = int_to_ptr.vmem [resolvable:$true] %s98_s6 }
  0x12   : > { %s610_s8 = scalar_lea.hbm %s787_s4, 64  ;;  %s614_s11 = scalar_lea.hbm %s942_s0, 192 }
  0x13   : > { %p611_p10 = scmp.ne.s32.totalorder %s787_s4, %s610_s8  ;;  %p615_p13 = scmp.lt.u32.totalorder %s787_s4, %s942_s0 }
  0x14   : > { %p616_p0 = scmp.lt.u32.totalorder %s614_s11, %s610_s8  ;;  %p618_p2 = scmp.lt.u32.totalorder %s610_s8, %s787_s4 }
  0x15   : > { %p612_p11 = pnand %p611_p10, %p565_p7 }
  0x16   : > { %p617_p1 = por %p616_p0, %p615_p13 }
  0x17   : > { %p613_p12 = pneg %p612_p11 }
  0x18   : > { %p619_p3 = por %p618_p2, %p617_p1 }
  0x1a   : > { %p620_p4 = pnand %p619_p3, %p613_p12 }
  0x1c   : > { %623 = shalt.err (!%p620_p4)
}
  0x1d   : > { %s624_s20 = scalar_lea.vmem %s790_s6, 64  ;;  %s712_s21 = smov [#allocation1]  }
  0x1e   : > { %p625_p10 = scmp.ne.s32.totalorder %s790_s6, %s624_s20  ;;  %s628_s22 = sshll.u32 %s712_s21, 4  ;;  %s629_s22 = int_to_ptr.vmem [resolvable:$false] %s628_s22 }
  0x1f   : > { %s630_s26 = scalar_lea.vmem %s629_s22, 128  ;;  %p631_p9 = scmp.lt.s32.totalorder %s790_s6, %s629_s22 }
  0x20   : > { %p626_p11 = pnand %p625_p10, %p565_p7  ;;  %p632_p6 = scmp.lt.s32.totalorder %s630_s26, %s624_s20 }
  0x22   : > { %p627_p8 = pneg %p626_p11  ;;  %p633_p13 = por %p632_p6, %p631_p9 }
  0x24   : > { %p634_p0 = pnand %p633_p13, %p627_p8 }
  0x26   : > { %637 = shalt.err (!%p634_p0)
}
  0x27   : > { %558 = dma.hbm_to_vmem [thread:$0]  (%p565_p7), %s787_s4, 64, %s790_s6, %s88_s7  }
  0x28   : > { %p949_p12 = scmp.lt.s32.totalorder %s706_s15, 4  ;;  %p950_p1 = scmp.ge.s32.totalorder %s706_s15, 1 }
  0x2a   : > { %p104_p2 = pnand %p950_p1, %p949_p12 }
  0x2c   : > { %107 = sbr.rel (%p104_p2) target bundleno = 474 (0x1da), region = 20 }
  0x33   : > { %s109_s27 = sand.u32 1, %s756_s16  }
  0x34   : > { %s110_s28 = scalar_lea.sflag [#allocation2], %s109_s27 }
  0x35   : > { %686 = dma.done.wait %s110_s28, 64  }
  0x36   : > { %687 = vsyncadd %s110_s28, 4294967232  ;;  %s819_s29 = sshll.u32 %s109_s27, 2  ;;  %s145_s30 = sand.u32 7, %s756_s16   ;;  %v150_v0 = vlaneseq  ;;  %v713_v2 = vmov 0  }
  0x37   : > { %s825_s4 = scalar_lea.vmem [#allocation6], %s145_s30  ;;  %s128_s5 = sand.u32 1, %s698_s13  }
  0x38   : > { %v823_v1 = vshrl.u32 %v150_v0, 7  ;;  %149 = vst [vmem:[%s825_s4] sm:$0x1] %v713_v2  ;;  %s832_s6 = sshll.u32 %s128_s5, 2  ;;  %s119_s7 = scalar_lea.vmem [#allocation1], %s819_s29 }
  0x39   : > { %v139_v3 = vld [vmem:[%s119_s7] sm:$0xf]  ;;  %s123_s8 = scalar_lea.vmem [#allocation5], %s819_s29  ;;  %s130_s9 = scalar_lea.vmem [#allocation7], %s832_s6 }
  0x3a   : > { %154 = vst [vmem:[#allocation10] sm:$0xff] %v823_v1  ;;  %140 = vst [vmem:[#allocation0] sm:$0xf] %v139_v3  ;;  %s136_s10 = scalar_lea.vmem [#allocation9], %s832_s6  ;;  %s838_s11 = scalar_lea.vmem [#allocation8], %s145_s30 }
  0x3b   : > { %s840_s17 = smov 0  }
  0x41   : > { %v143_v4 = vld [vmem:[#allocation0] sm:$0xff] }
  0x42   : > { %144 = vst [vmem:[#allocation4] sm:$0xff] %v143_v4 }
  0x43 LB: >> { %vm170_vm0 = vcmp.lt.s32.totalorder %v823_v1, 3  ;;  %v847_v7 = vstv %s710_s17  ;;  %s211_s19 = ssub.s32 128, %s710_s17  ;;  %v217_v37 = vand.u32 127, %v150_v0  ;;  %v220_v39 = vld [vmem:[%s825_s4] ss:$0 sm:$0xff]  ;;  %s223_s20 = scalar_lea.vmem [#allocation4], %s710_s17  ;;  %s710_s17 = sphi %s840_s17, %s160_s17  }
  0x44   : >> { %vm169_vm1 = vcmp.ge.s32.totalorder %v823_v1, %v847_v7  ;;  %s229_s22 = scalar_lea.vmem [#allocation10], %s710_s17  ;;  %vm249_vm15 = vcmp.gt.s32.totalorder %v823_v1, %v847_v7  ;;  %s160_s17 = sadd.s32 1, %s710_s17  }
  0x45   : >> { %vm171_vm3 = vmand %vm169_vm1, %vm170_vm0  ;;  %vm241_vm12 = vcmp.gt.s32.totalorder %v217_v37, %v847_v7  ;;  %vm218_vm13 = vcmp.eq.s32.totalorder %v217_v37, %v847_v7  ;;  %v231_v41 = vld [vmem:[%s229_s22] ss:$0 sm:$0xff]  ;;  %p157_p6 = scmp.ge.s32.totalorder %s160_s17, 3  }
  0x46   : >> { %vm253_vm1 = vmand %vm249_vm15, %vm218_vm13  ;;  %s946_s28 = sshrl.u32 (%p157_p6), %s756_s16, 3  ;;  %s550_s30 = sshll.u32 (%p157_p6), %s756_s16, 2 }
  0x47   : > { %s551_s7 = sshll.u32 (%p157_p6), %s946_s28, 6 }
  0x49   : >> { %v165_v5 = vld [vmem:[#allocation4] sm:$0xff]  ;;  %v225_v40 = vld [vmem:[%s223_s20] ss:$0 sm:$0xff] }
  0x4a   : >> { %v166_v6 = vand.u32 2147483647, %v165_v5 }
  0x4c   : >> { %vm546_vm2 = vcmp.gt.f32.partialorder %v166_v6, -inf }
  0x4d   : >> { %vm173_vm4 = vmand %vm171_vm3, %vm546_vm2 }
  0x4e   : >> { %v174_v8 = vsel %vm173_vm4, %v823_v1, %v847_v7  ;;  %v175_v9 = vsel %vm173_vm4, %v166_v6, -inf }
  0x4f   : >> { %v176_v10 = vrot.slane %v175_v9, 1  ;;  %v177_v11 = vrot.slane %v174_v8, 1 }
  0x51   : >> { %vm178_vm5 = vcmp.ge.f32.partialorder %v176_v10, %v175_v9  ;;  %v181_v12 = vrot.slane %v176_v10, 1  ;;  %v182_v13 = vrot.slane %v177_v11, 1 }
  0x52   : >> { %v179_v14 = vsel %vm178_vm5, %v176_v10, %v175_v9  ;;  %v180_v15 = vsel %vm178_vm5, %v177_v11, %v174_v8 }
  0x53   : >> { %vm183_vm6 = vcmp.ge.f32.partialorder %v181_v12, %v179_v14  ;;  %v186_v16 = vrot.slane %v181_v12, 1  ;;  %v187_v17 = vrot.slane %v182_v13, 1 }
  0x54   : >> { %v184_v18 = vsel %vm183_vm6, %v181_v12, %v179_v14  ;;  %v185_v19 = vsel %vm183_vm6, %v182_v13, %v180_v15 }
  0x55   : >> { %vm188_vm7 = vcmp.ge.f32.partialorder %v186_v16, %v184_v18  ;;  %v191_v20 = vrot.slane %v186_v16, 1  ;;  %v192_v21 = vrot.slane %v187_v17, 1 }
  0x56   : >> { %v189_v22 = vsel %vm188_vm7, %v186_v16, %v184_v18  ;;  %v190_v23 = vsel %vm188_vm7, %v187_v17, %v185_v19 }
  0x57   : >> { %vm193_vm8 = vcmp.ge.f32.partialorder %v191_v20, %v189_v22  ;;  %v196_v24 = vrot.slane %v191_v20, 1  ;;  %v197_v25 = vrot.slane %v192_v21, 1 }
  0x58   : >> { %v194_v26 = vsel %vm193_vm8, %v191_v20, %v189_v22  ;;  %v195_v27 = vsel %vm193_vm8, %v192_v21, %v190_v23 }
  0x59   : >> { %vm198_vm9 = vcmp.ge.f32.partialorder %v196_v24, %v194_v26  ;;  %v201_v28 = vrot.slane %v196_v24, 1  ;;  %v202_v29 = vrot.slane %v197_v25, 1 }
  0x5a   : >> { %v199_v30 = vsel %vm198_vm9, %v196_v24, %v194_v26  ;;  %v200_v31 = vsel %vm198_vm9, %v197_v25, %v195_v27 }
  0x5b   : >> { %vm203_vm10 = vcmp.ge.f32.partialorder %v201_v28, %v199_v30  ;;  %v206_v32 = vrot.slane %v201_v28, 1  ;;  %v207_v33 = vrot.slane %v202_v29, 1 }
  0x5c   : >> { %v204_v34 = vsel %vm203_vm10, %v201_v28, %v199_v30  ;;  %v205_v35 = vsel %vm203_vm10, %v202_v29, %v200_v31 }
  0x5d   : >> { %vm208_vm11 = vcmp.ge.f32.partialorder %v206_v32, %v204_v34 }
  0x5e   : >> { %v210_v36 = vsel %vm208_vm11, %v207_v33, %v205_v35 }
  0x5f   : >> { %212 = vrot.lane.b32.xlu0 %v210_v36, %s211_s19  ;;  %s341_s19 = scalar_lea.vmem (%p157_p6), %s943_s1, %s550_s30 }
  0xd1   : >> { %v213_v38 = vpop.permute.xlu0 %212 }
  0xd2   : >> { %555 = vpush %v213_v38 }
 0x103   : >> { %s556_s21 = spop %555 }
 0x104   : >> { %v219_v42 = vstv %s556_s21  ;;  %s224_s26 = scalar_lea.vmem [#allocation4], %s556_s21  ;;  %s230_s27 = scalar_lea.vmem [#allocation10], %s556_s21 }
 0x105   : >> { %v226_v43 = vld [vmem:[%s224_s26] ss:$0 sm:$0xff]  ;;  %v221_v45 = vsel %vm218_vm13, %v219_v42, %v220_v39 }
 0x106   : >> { %v232_v44 = vld [vmem:[%s230_s27] ss:$0 sm:$0xff]  ;;  %227 = vst [vmem:[%s224_s26] sm:$0x1] %v225_v40  ;;  %vm235_vm14 = vcmp.ne.f32.partialorder %v226_v43, 0.0  ;;  %222 = vst [vmem:[%s825_s4] sm:$0x1] %v221_v45  ;;  %v242_v52 = vsel %vm241_vm12, %v226_v43, 0.0 }
 0x107   : >> { %233 = vst [vmem:[%s230_s27] sm:$0x1] %v231_v41  ;;  %228 = vst [vmem:[%s223_s20] sm:$0x1] %v226_v43  ;;  %s383_s26 = sshll.u32 (%p157_p6), %s130_s9, 4  ;;  %s332_s27 = scalar_lea.sflag (%p157_p6), [#allocation3], %s128_s5  ;;  %s384_s26 = int_to_ptr.vmem [resolvable:$true] %s383_s26 }
 0x108   : >> { %234 = vst [vmem:[%s229_s22] sm:$0x1] %v232_v44  ;;  %vm236_vm0 = vmand %vm218_vm13, %vm235_vm14  ;;  %s890_s22 = scalar_lea.hbm (%p157_p6), %s944_s2, %s551_s7  ;;  %s638_s28 = scalar_lea.vmem (%p157_p6), %s384_s26, 64 }
 0x109   : >> { %v237_v46 = vsel %vm236_vm0, %v226_v43, 1.0  ;;  %p639_p7 = scmp.ne.s32.totalorder (%p157_p6), %s384_s26, %s638_s28  ;;  %s714_s4 = smov (%p157_p6), [#allocation7]  }
 0x10a   : >> { %v250_v47 = vsel %vm249_vm15, %v237_v46, 1.0  ;;  %s642_s30 = sshll.u32 (%p157_p6), %s714_s4, 4  ;;  %s643_s30 = int_to_ptr.vmem [resolvable:$false] %s642_s30 }
 0x10b   : >> { %608 = vrcp.f32 %v250_v47  ;;  %p640_p8 = pnand (%p157_p6), %p639_p7, %p773_p5  ;;  %s644_s29 = scalar_lea.vmem (%p157_p6), %s643_s30, 128 }
 0x10c   : > { %p645_p3 = scmp.lt.s32.totalorder (%p157_p6), %s384_s26, %s643_s30  ;;  %p646_p4 = scmp.lt.s32.totalorder (%p157_p6), %s644_s29, %s638_s28 }
 0x10d   : > { %v318_v58 = vld [vmem:[#allocation6] sm:$0xf] (%p157_p6)  ;;  %p641_p9 = pneg (%p157_p6), %p640_p8 }
 0x10e   : >> { %v246_v49 = vld [vmem:[#allocation4] sm:$0xff]  ;;  %320 = vst [vmem:[%s130_s9] sm:$0xf] (%p157_p6), %v318_v58  ;;  %p647_p10 = por (%p157_p6), %p646_p4, %p645_p3 }
 0x10f   : > { %v260_v56 = vld [vmem:[#allocation10] sm:$0xff] (%p157_p6) }
 0x110   : > { %p648_p11 = pnand (%p157_p6), %p647_p10, %p641_p9 }
 0x115   : >> { %v609_v48 = vpop.eup %608 }
 0x116   : >> { %v252_v50 = vmul.f32 %v609_v48, %v246_v49 }
 0x118   : >> { %v254_v51 = vsel %vm253_vm1, %v252_v50, 0.0 }
 0x119   : >> { %255 = vadd.xlane.f32.xlu0 %v254_v51 }
 0x146   : > { %276 = vxpose.xlu0.b32.start.end [1/1] (short) (narrow) (%p157_p6), %v260_v56, 8 }
 0x1a5   : > { %159 = sbr.rel (!%p157_p6) target bundleno = 67 (0x43), region = 173 }
 0x1a6   : >> { %v256_v53 = vpop.xlane.xlu0 %255 }
 0x1a7   : >> { %v257_v54 = vmul.f32 %v256_v53, %v242_v52 }
 0x1a9   : >> { %v258_v55 = vsub.f32 %v252_v50, %v257_v54 }
 0x1ab   : >> { %259 = vst [vmem:[#allocation4] sm:$0xff] %v258_v55 }
 0x1b2   : > { %v312_v57 = vld [vmem:[#allocation4] sm:$0xf] }
 0x1b3   : > { %314 = vst [vmem:[%s123_s8] sm:$0xf] %v312_v57 }
 0x1ba   : > { %v357_v59 = vld [vmem:[%s123_s8] sm:$0xf] }
 0x1bb   : > { %358 = vst [vmem:[%s341_s19] sm:$0xf] %v357_v59 }
 0x1bc   : > { %651 = shalt.err (!%p648_p11)
}
 0x1bd   : > { %s652_s5 = scalar_lea.hbm %s890_s22, 64  ;;  %s656_s7 = scalar_lea.hbm %s944_s2, 64 }
 0x1be   : > { %p653_p13 = scmp.ne.s32.totalorder %s890_s22, %s652_s5  ;;  %p657_p1 = scmp.lt.u32.totalorder %s890_s22, %s944_s2 }
 0x1bf   : > { %p658_p2 = scmp.lt.u32.totalorder %s656_s7, %s652_s5  ;;  %p660_p7 = scmp.lt.u32.totalorder %s652_s5, %s890_s22 }
 0x1c0   : > { %p654_p0 = pnand %p653_p13, %p773_p5 }
 0x1c1   : > { %p659_p6 = por %p658_p2, %p657_p1 }
 0x1c2   : > { %p655_p12 = pneg %p654_p0 }
 0x1c3   : > { %p661_p8 = por %p660_p7, %p659_p6 }
 0x1c5   : > { %p662_p9 = pnand %p661_p8, %p655_p12 }
 0x1c7   : > { %665 = shalt.err (!%p662_p9)
}
 0x1c8   : > { %559 = dma.vmem_to_hbm [thread:$0]  (%p773_p5), %s384_s26, 64, %s890_s22, %s332_s27   ;;  %v292_v60 = vpop.trf.xlu0 }
 0x1c9   : > { %308 = vst [vmem:[%s838_s11] sm:$0x1] %v292_v60  ;;  %s951_s28 = sshrl.u32 (%p773_p5), %s756_s16, 3 }
 0x1ca   : > { %s552_s20 = sshll.u32 (%p773_p5), %s951_s28, 2 }
 0x1cb   : > { %389 = sbr.rel (!%p773_p5) target bundleno = 474 (0x1da), region = 66  ;;  %s392_s30 = scalar_lea.vmem (%p773_p5), %s945_s3, %s552_s20 }
 0x1d0   : > { %v324_v61 = vld [vmem:[#allocation8] sm:$0xf] }
 0x1d1   : > { %326 = vst [vmem:[%s136_s10] sm:$0xf] %v324_v61 }
 0x1d8   : > { %v408_v62 = vld [vmem:[%s136_s10] sm:$0xf] }
 0x1d9   : > { %409 = vst [vmem:[%s392_s30] sm:$0xf] %v408_v62 }
 0x1da PF: > { %p566_p3 = scmp.ge.s32.totalorder %s706_s15, 2  ;;  %s436_s11 = sand.u32 1, %s694_s12  }
 0x1db   : > { %p952_p4 = scmp.ne.s32.totalorder %s948_s25, 0  ;;  %s437_s24 = scalar_lea.sflag [#allocation3], %s436_s11 }
 0x1dd   : > { %p562_p5 = pnand %p566_p3, %p952_p4 }
 0x1df   : > { %689 = dma.done.wait (!%p562_p5), %s437_s24, 64  }
 0x1e0   : > { %691 = vsyncadd (!%p562_p5), %s437_s24, 4294967232  ;;  %p13_p10 = scmp.ge.s32.totalorder %s760_s18, 5   ;;  %s953_s12 = smov %s698_s13 }
 0x1e1   : > { %s954_s13 = smov %s702_s14  ;;  %s955_s14 = smov %s771_s23 }
 0x1e2   : > { %s956_s15 = smov %s760_s18  ;;  %15 = sbr.rel (!%p13_p10) target bundleno = 5 (0x5), region = 184 }
 0x1e9   :  { %449 = vsyncpa [#allocation2], 1 }
 0x1ea   :  { %451 = vsyncpa [#allocation2 + $0x1], 1 }
 0x1eb   :  { %452 = vsyncpa [#allocation3], 1 }
 0x1ec   :  { %454 = vsyncpa [#allocation3 + $0x1], 1 }

// kernel: custom-call.13
= control target key start
LH: loop header
LB: loop body
LE: loop exit
PB: predicated region body
PF: predicated region fallthrough
CT: control target
= control target key end

     0   :  { %s343_s6 = smov 0   ;;  %s345_s7 = smov 0   ;;  %s390_s0 = inlined_call_operand.vmem [shape: f32[3,1,3,3], index: 0, kind: input, shape index: {}]   ;;  %s391_s1 = inlined_call_operand.vmem [shape: f32[3,1,3,3], index: 1, kind: output, shape index: {}]  }
   0x1   :  { %s347_s8 = smov 0  }
   0x2 LB: > { %s269_s9 = sadd.s32 4294967295, %s330_s8   ;;  %s33_s10 = sadd.s32 1, %s326_s7  ;;  %s330_s8 = sphi %s347_s8, %s7_s8   ;;  %s326_s7 = sphi %s345_s7, %s393_s7   ;;  %s322_s6 = sphi %s343_s6, %s392_s6  }
   0x3   : > { %p35_p0 = scmp.ge.s32.totalorder %s33_s10, 3  ;;  %p271_p1 = scmp.ge.s32.totalorder %s330_s8, 3 }
   0x4   : > { %s49_s11 = sand.u32 (!%p271_p1), 1, %s330_s8   ;;  %s273_s12 = sshll.u32 (!%p271_p1), %s326_s7, 2 }
   0x5   : > { %s395_s10 = smov (%p35_p0, %s33_s10), 0  ;;  %47 = sbr.rel (%p271_p1) target bundleno = 12 (0xc), region = 16 }
   0x6   : > { %s272_s13 = sshll.u32 (!%p271_p1), %s49_s11, 2  ;;  %s56_s16 = scalar_lea.vmem (!%p271_p1), %s390_s0, %s273_s12 }
   0x7   : > { %v72_v0 = vld [vmem:[%s56_s16] sm:$0xf] (!%p271_p1)  ;;  %s51_s17 = scalar_lea.vmem (!%p271_p1), [#allocation1], %s272_s13 }
   0x8   : > { %73 = vst [vmem:[%s51_s17] sm:$0xf] (!%p271_p1), %v72_v0 }
   0xc PF: > { %p274_p2 = scmp.ge.s32.totalorder %s330_s8, 1  ;;  %p89_p3 = scmp.lt.s32.totalorder %s330_s8, 4 }
   0xe   : > { %p90_p4 = pnand %p274_p2, %p89_p3 }
  0x10   : > { %93 = sbr.rel (%p90_p4) target bundleno = 511 (0x1ff), region = 50 }
  0x17   : > { %s370_s18 = sand.u32 1, %s269_s9   ;;  %v111_v1 = vlaneseq  ;;  %v332_v11 = vmov -1.0   ;;  %s278_s22 = sshll.u32 %s322_s6, 2 }
  0x18   : > { %s275_s19 = sshll.u32 %s370_s18, 2  ;;  %s178_s25 = scalar_lea.vmem %s391_s1, %s278_s22 }
  0x19   : > { %s102_s20 = scalar_lea.vmem [#allocation1], %s275_s19  ;;  %v112_v3 = vand.u32 127, %v111_v1  ;;  %v115_v4 = vshrl.u32 %v111_v1, 7  ;;  %s106_s21 = scalar_lea.vmem [#allocation3], %s275_s19 }
  0x1a   : > { %v109_v2 = vld [vmem:[%s102_s20] sm:$0xf] }
  0x1b   : > { %110 = vst [vmem:[#allocation0] sm:$0xf] %v109_v2  ;;  %vm113_vm0 = vcmp.lt.s32.totalorder %v112_v3, 3  ;;  %vm122_vm1 = vcmp.ge.s32.totalorder %v115_v4, %v112_v3  ;;  %vm117_vm2 = vcmp.eq.s32.totalorder %v115_v4, %v112_v3  ;;  %vm136_vm4 = vcmp.eq.s32.totalorder %v112_v3, 0 }
  0x1c   : > { %vm123_vm3 = vmand %vm122_vm1, %vm113_vm0  ;;  %vm133_vm5 = vcmp.eq.s32.totalorder %v112_v3, %v115_v4  ;;  %v137_v12 = vsel %vm136_vm4, 1.0, %v332_v11  ;;  %vm144_vm6 = vcmp.eq.s32.totalorder %v112_v3, 1  ;;  %vm154_vm7 = vcmp.eq.s32.totalorder %v112_v3, 2 }
  0x1d   : > { %v138_v13 = vsel %vm133_vm5, %v137_v12, 0.0 }
  0x22   : > { %v118_v5 = vld [vmem:[#allocation0] sm:$0xff] }
  0x23   : > { %v119_v6 = vsel %vm117_vm2, %v118_v5, 0.0  ;;  %v124_v7 = vsel %vm123_vm3, %v118_v5, 0.0 }
  0x24   : > { %120 = vadd.xlane.f32.xlu0 %v119_v6 }
  0xb1   : > { %v121_v8 = vpop.xlane.xlu0 %120 }
  0xb2   : > { %306 = vrcp.f32 %v121_v8  ;;  %vm161_vm8 = vweird.f32 %v121_v8 }
  0xbc   : > { %v307_v9 = vpop.eup %306 }
  0xbd   : > { %v126_v10 = vmul.f32 %v307_v9, %v124_v7 }
  0xbf   : > { %127 = vst [vmem:[#allocation4] sm:$0xff] %v126_v10 }
  0xc6   : > { %v140_v14 = vld [vmem:[#allocation4 + $0x1] ss:$0 sm:$0xff]  ;;  %v150_v17 = vld [vmem:[#allocation4 + $0x2] ss:$0 sm:$0xff] }
  0xc7   : > { %v141_v15 = vxor.u32 2147483648, %v140_v14  ;;  %v151_v19 = vxor.u32 2147483648, %v150_v17 }
  0xc9   : > { %v145_v16 = vmul.f32 %v141_v15, %v138_v13 }
  0xcb   : > { %146 = vadd.xlane.f32.xlu0 %v145_v16 }
 0x158   : > { %v147_v18 = vpop.xlane.xlu0 %146 }
 0x159   : > { %v148_v20 = vsel %vm144_vm6, %v147_v18, %v138_v13 }
 0x15a   : > { %v155_v21 = vmul.f32 %v151_v19, %v148_v20 }
 0x15c   : > { %156 = vadd.xlane.f32.xlu1 %v155_v21 }
 0x1e9   : > { %v157_v22 = vpop.xlane.xlu1 %156 }
 0x1ea   : > { %v158_v23 = vsel %vm154_vm7, %v157_v22, %v148_v20 }
 0x1eb   : > { %v160_v24 = vmul.f32 %v307_v9, %v158_v23 }
 0x1ed   : > { %v162_v25 = vsel %vm161_vm8, %v158_v23, %v160_v24 }
 0x1ee   : > { %163 = vst [vmem:[#allocation2] sm:$0xff] %v162_v25 }
 0x1f5   : > { %v167_v26 = vld [vmem:[#allocation2] sm:$0xf] }
 0x1f6   : > { %169 = vst [vmem:[%s106_s21] sm:$0xf] %v167_v26 }
 0x1fd   : > { %v194_v27 = vld [vmem:[%s106_s21] sm:$0xf] }
 0x1fe   : > { %195 = vst [vmem:[%s178_s25] sm:$0xf] %v194_v27 }
 0x1ff PF: > { %s7_s8 = sadd.s32 1, %s330_s8   ;;  %s392_s6 = smov %s326_s7 }
 0x200   : > { %p4_p5 = scmp.ge.s32.totalorder %s7_s8, 5   ;;  %s393_s7 = smov %s395_s10 }
 0x202   :  { %6 = sbr.rel (!%p4_p5) target bundleno = 2 (0x2), region = 112 }

// kernel: custom-call.12
= control target key start
LH: loop header
LB: loop body
LE: loop exit
PB: predicated region body
PF: predicated region fallthrough
CT: control target
= control target key end

     0   :  { %s342_s6 = smov 0   ;;  %s344_s7 = smov 0   ;;  %s389_s0 = inlined_call_operand.vmem [shape: f32[3,1,3,3], index: 0, kind: input, shape index: {}]   ;;  %s390_s1 = inlined_call_operand.vmem [shape: f32[3,1,3,3], index: 1, kind: output, shape index: {}]  }
   0x1   :  { %s346_s8 = smov 0  }
   0x2 LB: > { %s268_s9 = sadd.s32 4294967295, %s329_s8   ;;  %s33_s10 = sadd.s32 1, %s325_s7  ;;  %s329_s8 = sphi %s346_s8, %s7_s8   ;;  %s325_s7 = sphi %s344_s7, %s392_s7   ;;  %s321_s6 = sphi %s342_s6, %s391_s6  }
   0x3   : > { %p35_p0 = scmp.ge.s32.totalorder %s33_s10, 3  ;;  %p270_p1 = scmp.ge.s32.totalorder %s329_s8, 3 }
   0x4   : > { %s49_s11 = sand.u32 (!%p270_p1), 1, %s329_s8   ;;  %s272_s12 = sshll.u32 (!%p270_p1), %s325_s7, 2 }
   0x5   : > { %s394_s10 = smov (%p35_p0, %s33_s10), 0  ;;  %47 = sbr.rel (%p270_p1) target bundleno = 12 (0xc), region = 16 }
   0x6   : > { %s271_s13 = sshll.u32 (!%p270_p1), %s49_s11, 2  ;;  %s56_s16 = scalar_lea.vmem (!%p270_p1), %s389_s0, %s272_s12 }
   0x7   : > { %v72_v0 = vld [vmem:[%s56_s16] sm:$0xf] (!%p270_p1)  ;;  %s51_s17 = scalar_lea.vmem (!%p270_p1), [#allocation1], %s271_s13 }
   0x8   : > { %73 = vst [vmem:[%s51_s17] sm:$0xf] (!%p270_p1), %v72_v0 }
   0xc PF: > { %p273_p2 = scmp.ge.s32.totalorder %s329_s8, 1  ;;  %p89_p3 = scmp.lt.s32.totalorder %s329_s8, 4 }
   0xe   : > { %p90_p4 = pnand %p273_p2, %p89_p3 }
  0x10   : > { %93 = sbr.rel (%p90_p4) target bundleno = 511 (0x1ff), region = 50 }
  0x17   : > { %s369_s18 = sand.u32 1, %s268_s9   ;;  %v111_v1 = vlaneseq  ;;  %v331_v11 = vmov -1.0   ;;  %s277_s22 = sshll.u32 %s321_s6, 2 }
  0x18   : > { %s274_s19 = sshll.u32 %s369_s18, 2  ;;  %s177_s25 = scalar_lea.vmem %s390_s1, %s277_s22 }
  0x19   : > { %s102_s20 = scalar_lea.vmem [#allocation1], %s274_s19  ;;  %v112_v3 = vand.u32 127, %v111_v1  ;;  %v115_v4 = vshrl.u32 %v111_v1, 7  ;;  %s106_s21 = scalar_lea.vmem [#allocation3], %s274_s19 }
  0x1a   : > { %v109_v2 = vld [vmem:[%s102_s20] sm:$0xf] }
  0x1b   : > { %110 = vst [vmem:[#allocation0] sm:$0xf] %v109_v2  ;;  %vm113_vm0 = vcmp.lt.s32.totalorder %v112_v3, 3  ;;  %vm122_vm1 = vcmp.le.s32.totalorder %v115_v4, %v112_v3  ;;  %vm117_vm2 = vcmp.eq.s32.totalorder %v115_v4, %v112_v3  ;;  %vm136_vm4 = vcmp.eq.s32.totalorder %v112_v3, 2 }
  0x1c   : > { %vm123_vm3 = vmand %vm122_vm1, %vm113_vm0  ;;  %vm133_vm5 = vcmp.eq.s32.totalorder %v112_v3, %v115_v4  ;;  %v137_v12 = vsel %vm136_vm4, 1.0, %v331_v11  ;;  %vm144_vm6 = vcmp.eq.s32.totalorder %v112_v3, 1  ;;  %vm153_vm7 = vcmp.eq.s32.totalorder %v112_v3, 0 }
  0x1d   : > { %v138_v13 = vsel %vm133_vm5, %v137_v12, 0.0 }
  0x22   : > { %v118_v5 = vld [vmem:[#allocation0] sm:$0xff] }
  0x23   : > { %v119_v6 = vsel %vm117_vm2, %v118_v5, 0.0  ;;  %v124_v7 = vsel %vm123_vm3, %v118_v5, 0.0 }
  0x24   : > { %120 = vadd.xlane.f32.xlu0 %v119_v6 }
  0xb1   : > { %v121_v8 = vpop.xlane.xlu0 %120 }
  0xb2   : > { %305 = vrcp.f32 %v121_v8  ;;  %vm160_vm8 = vweird.f32 %v121_v8 }
  0xbc   : > { %v306_v9 = vpop.eup %305 }
  0xbd   : > { %v126_v10 = vmul.f32 %v306_v9, %v124_v7 }
  0xbf   : > { %127 = vst [vmem:[#allocation4] sm:$0xff] %v126_v10 }
  0xc6   : > { %v140_v14 = vld [vmem:[#allocation4 + $0x1] ss:$0 sm:$0xff]  ;;  %v149_v17 = vld [vmem:[#allocation4] ss:$0 sm:$0xff] }
  0xc7   : > { %v141_v15 = vxor.u32 2147483648, %v140_v14  ;;  %v150_v19 = vxor.u32 2147483648, %v149_v17 }
  0xc9   : > { %v145_v16 = vmul.f32 %v141_v15, %v138_v13 }
  0xcb   : > { %146 = vadd.xlane.f32.xlu0 %v145_v16 }
 0x158   : > { %v147_v18 = vpop.xlane.xlu0 %146 }
 0x159   : > { %v148_v20 = vsel %vm144_vm6, %v147_v18, %v138_v13 }
 0x15a   : > { %v154_v21 = vmul.f32 %v150_v19, %v148_v20 }
 0x15c   : > { %155 = vadd.xlane.f32.xlu1 %v154_v21 }
 0x1e9   : > { %v156_v22 = vpop.xlane.xlu1 %155 }
 0x1ea   : > { %v157_v23 = vsel %vm153_vm7, %v156_v22, %v148_v20 }
 0x1eb   : > { %v159_v24 = vmul.f32 %v306_v9, %v157_v23 }
 0x1ed   : > { %v161_v25 = vsel %vm160_vm8, %v157_v23, %v159_v24 }
 0x1ee   : > { %162 = vst [vmem:[#allocation2] sm:$0xff] %v161_v25 }
 0x1f5   : > { %v166_v26 = vld [vmem:[#allocation2] sm:$0xf] }
 0x1f6   : > { %168 = vst [vmem:[%s106_s21] sm:$0xf] %v166_v26 }
 0x1fd   : > { %v193_v27 = vld [vmem:[%s106_s21] sm:$0xf] }
 0x1fe   : > { %194 = vst [vmem:[%s177_s25] sm:$0xf] %v193_v27 }
 0x1ff PF: > { %s7_s8 = sadd.s32 1, %s329_s8   ;;  %s391_s6 = smov %s325_s7 }
 0x200   : > { %p4_p5 = scmp.ge.s32.totalorder %s7_s8, 5   ;;  %s392_s7 = smov %s394_s10 }
 0x202   :  { %6 = sbr.rel (!%p4_p5) target bundleno = 2 (0x2), region = 111 }

// kernel: squeeze.13
= control target key start
LH: loop header
LB: loop body
LE: loop exit
PB: predicated region body
PF: predicated region fallthrough
CT: control target
= control target key end

     0   :  { %s207_s0 = inlined_call_operand.vmem [shape: f32[128], index: 0, kind: input, shape index: {}]   ;;  %s208_s1 = inlined_call_operand.hbm [shape: f32[2,8,8,1], index: 1, kind: output, shape index: {}]  }
   0x1   :  { %v5_v0 = vld [vmem:[%s207_s0] sm:$0x1] }
   0x2   :  { %6 = vst [vmem:[#allocation2] sm:$0x1] %v5_v0 }
   0x3   :  { %2 = vsyncpa [#allocation1], 0  ;;  %s150_s0 = smov 120   ;;  %s151_s8 = smov 104   ;;  %vm8_vm0 = vcmask 64512  }
   0x4   :  { %s152_s9 = smov 112   ;;  %s153_s10 = smov 96  }
   0x5   :  { %s154_s11 = smov 88   ;;  %s155_s12 = smov 80  }
   0x6   :  { %s156_s13 = smov 72   ;;  %s157_s14 = smov 64  }
   0x7   :  { %s158_s15 = smov 56   ;;  %s159_s16 = smov 48  }
   0x8   :  { %s160_s17 = smov 40   ;;  %s161_s18 = smov 32  }
   0x9   :  { %v10_v1 = vld [vmem:[#allocation2] sm:$0x1]   ;;  %s162_s19 = smov 24   ;;  %s163_s20 = smov 16  }
   0xa   :  { %v22_v2 = vld [vmem:[#allocation2] sm:$0x1]   ;;  %11 = vrot.lane.b32.xlu0 %v10_v1, %s150_s0  ;;  %s164_s21 = smov 8   ;;  %s165_s22 = smov [#allocation0]  }
   0xb   :  { %23 = vrot.lane.b32.xlu1 %v22_v2, %s151_s8  ;;  %v16_v3 = vld [vmem:[#allocation2] sm:$0x1]   ;;  %s104_s23 = sshll.u32 %s165_s22, 4  ;;  %s105_s23 = int_to_ptr.vmem [resolvable:$true] %s104_s23 }
   0xc   :  { %v28_v4 = vld [vmem:[#allocation2] sm:$0x1]   ;;  %s126_s24 = scalar_lea.vmem %s105_s23, 256  ;;  %p131_p1 = scmp.lt.s32.totalorder %s105_s23, %s105_s23 }
   0xd   :  { %v34_v5 = vld [vmem:[#allocation2] sm:$0x1]   ;;  %p127_p0 = scmp.ne.s32.totalorder %s105_s23, %s126_s24  ;;  %p132_p2 = scmp.lt.s32.totalorder %s126_s24, %s126_s24 }
   0xe   :  { %17 = vrot.lane.b32.xlu0 %v16_v3, %s152_s9  ;;  %v40_v6 = vld [vmem:[#allocation2] sm:$0x1]  }
   0xf   :  { %29 = vrot.lane.b32.xlu1 %v28_v4, %s153_s10  ;;  %v46_v7 = vld [vmem:[#allocation2] sm:$0x1]   ;;  %p133_p3 = por %p132_p2, %p131_p1 }
  0x10   :  { %v52_v8 = vld [vmem:[#allocation2] sm:$0x1]  }
  0x11   :  { %v58_v9 = vld [vmem:[#allocation2] sm:$0x1]   ;;  %p134_p4 = pnand %p133_p3, %p127_p0 }
  0x12   :  { %35 = vrot.lane.b32.xlu0 %v34_v5, %s154_s11  ;;  %v64_v10 = vld [vmem:[#allocation2] sm:$0x1]  }
  0x13   :  { %41 = vrot.lane.b32.xlu1 %v40_v6, %s155_s12  ;;  %v7_v11 = vld [vmem:[#allocation2] sm:$0x1]  }
  0x14   :  { %9 = vst.msk [vmem:[#allocation0] sm:$0x1] %vm8_vm0, %v7_v11   ;;  %v70_v12 = vld [vmem:[#allocation2] sm:$0x1]  }
  0x15   :  { %v76_v13 = vld [vmem:[#allocation2] sm:$0x1]  }
  0x16   :  { %47 = vrot.lane.b32.xlu0 %v46_v7, %s156_s13  ;;  %v82_v14 = vld [vmem:[#allocation2] sm:$0x1]  }
  0x17   :  { %53 = vrot.lane.b32.xlu1 %v52_v8, %s157_s14  ;;  %v88_v15 = vld [vmem:[#allocation2] sm:$0x1]  }
  0x18   :  { %v94_v16 = vld [vmem:[#allocation2] sm:$0x1]  }
  0x1a   :  { %59 = vrot.lane.b32.xlu0 %v58_v9, %s158_s15 }
  0x1b   :  { %65 = vrot.lane.b32.xlu1 %v64_v10, %s159_s16 }
  0x1e   :  { %71 = vrot.lane.b32.xlu0 %v70_v12, %s160_s17 }
  0x1f   :  { %77 = vrot.lane.b32.xlu1 %v76_v13, %s161_s18 }
  0x22   :  { %83 = vrot.lane.b32.xlu0 %v82_v14, %s162_s19 }
  0x23   :  { %89 = vrot.lane.b32.xlu1 %v88_v15, %s163_s20 }
  0x26   :  { %95 = vrot.lane.b32.xlu0 %v94_v16, %s164_s21 }
  0x7c   :  { %v12_v17 = vpop.permute.xlu0 %11  }
  0x7d   :  { %v24_v18 = vpop.permute.xlu1 %23   ;;  %15 = vst.msk [vmem:[#allocation0 + $0x1] sm:$0x1] %vm8_vm0, %v12_v17  }
  0x7e   :  { %27 = vst.msk [vmem:[#allocation0 + $0x3] sm:$0x1] %vm8_vm0, %v24_v18  }
  0x80   :  { %v18_v19 = vpop.permute.xlu0 %17  }
  0x81   :  { %v30_v20 = vpop.permute.xlu1 %29   ;;  %21 = vst.msk [vmem:[#allocation0 + $0x2] sm:$0x1] %vm8_vm0, %v18_v19  }
  0x82   :  { %33 = vst.msk [vmem:[#allocation0 + $0x4] sm:$0x1] %vm8_vm0, %v30_v20  }
  0x84   :  { %v36_v21 = vpop.permute.xlu0 %35  }
  0x85   :  { %v42_v22 = vpop.permute.xlu1 %41   ;;  %39 = vst.msk [vmem:[#allocation0 + $0x5] sm:$0x1] %vm8_vm0, %v36_v21  }
  0x86   :  { %45 = vst.msk [vmem:[#allocation0 + $0x6] sm:$0x1] %vm8_vm0, %v42_v22  }
  0x88   :  { %v48_v23 = vpop.permute.xlu0 %47  }
  0x89   :  { %v54_v24 = vpop.permute.xlu1 %53   ;;  %51 = vst.msk [vmem:[#allocation0 + $0x7] sm:$0x1] %vm8_vm0, %v48_v23  }
  0x8a   :  { %57 = vst.msk [vmem:[#allocation0 + $0x8] sm:$0x1] %vm8_vm0, %v54_v24  }
  0x8c   :  { %v60_v25 = vpop.permute.xlu0 %59  }
  0x8d   :  { %v66_v26 = vpop.permute.xlu1 %65   ;;  %63 = vst.msk [vmem:[#allocation0 + $0x9] sm:$0x1] %vm8_vm0, %v60_v25  }
  0x8e   :  { %69 = vst.msk [vmem:[#allocation0 + $0xa] sm:$0x1] %vm8_vm0, %v66_v26  }
  0x90   :  { %v72_v27 = vpop.permute.xlu0 %71  }
  0x91   :  { %v78_v28 = vpop.permute.xlu1 %77   ;;  %75 = vst.msk [vmem:[#allocation0 + $0xb] sm:$0x1] %vm8_vm0, %v72_v27  }
  0x92   :  { %81 = vst.msk [vmem:[#allocation0 + $0xc] sm:$0x1] %vm8_vm0, %v78_v28  }
  0x94   :  { %v84_v29 = vpop.permute.xlu0 %83  }
  0x95   :  { %v90_v30 = vpop.permute.xlu1 %89   ;;  %87 = vst.msk [vmem:[#allocation0 + $0xd] sm:$0x1] %vm8_vm0, %v84_v29  }
  0x96   :  { %93 = vst.msk [vmem:[#allocation0 + $0xe] sm:$0x1] %vm8_vm0, %v90_v30  }
  0x98   :  { %v96_v31 = vpop.permute.xlu0 %95  }
  0x99   :  { %99 = vst.msk [vmem:[#allocation0 + $0xf] sm:$0x1] %vm8_vm0, %v96_v31  }
  0x9a   :  { %137 = shalt.err (!%p134_p4)
}
  0x9b   :  { %s138_s27 = scalar_lea.hbm %s208_s1, 256 }
  0x9c   :  { %p139_p5 = scmp.ne.s32.totalorder %s208_s1, %s138_s27  ;;  %p142_p6 = scmp.lt.u32.totalorder %s138_s27, %s208_s1 }
  0x9e   :  { %p144_p7 = pnand %p142_p6, %p139_p5 }
  0xa0   :  { %147 = shalt.err (!%p144_p7)
}
  0xa1   :  { %107 = dma.vmem_to_hbm [thread:$0]  %s105_s23, 256, %s208_s1, [#allocation1]  }
  0xa2   :  { %148 = dma.done.wait [#allocation1], 256  }
  0xa3   :  { %149 = vsyncadd [#allocation1], 4294967040 }
  0xa4   :  { %109 = vsyncpa [#allocation1], 1 }

// kernel: mlp_decoder_forward.1
= control target key start
LH: loop header
LB: loop body
LE: loop exit
PB: predicated region body
PF: predicated region fallthrough
CT: control target
= control target key end

     0   :  { %vm122_vm0 = vcmask 261120   ;;  %v1413_v40 = vmov 0.0|0.0   ;;  %vm1414_vm1 = vmmov 0   ;;  %v1415_v41 = vmov 0.0   ;;  %s1687_s4 = inlined_call_operand.vmem [shape: bf16[128,64], index: 4, kind: input, shape index: {}]   ;;  %s1688_s0 = inlined_call_operand.vmem [shape: bf16[128,32], index: 0, kind: input, shape index: {}]   ;;  %s1689_s2 = inlined_call_operand.vmem [shape: bf16[128,32], index: 2, kind: input, shape index: {}]   ;;  %s1690_s1 = inlined_call_operand.vmem [shape: bf16[128,32], index: 1, kind: input, shape index: {}]   ;;  %s1691_s3 = inlined_call_operand.vmem [shape: bf16[128,32], index: 3, kind: input, shape index: {}]   ;;  %s1692_s7 = inlined_call_operand.vmem [shape: f32[4,1], index: 7, kind: input, shape index: {}]   ;;  %s1693_s5 = inlined_call_operand.vmem [shape: f32[1,64], index: 5, kind: input, shape index: {}]   ;;  %s1694_s6 = inlined_call_operand.vmem [shape: f32[4,64], index: 6, kind: input, shape index: {}]   ;;  %s1695_s8 = inlined_call_operand.vmem [shape: f32[4,128], index: 8, kind: output, shape index: {}]  }
   0x1   :  { %v1369_v0 = vld [vmem:[%s1687_s4] sm:$0xff]   ;;  %v1370_v1 = vld [vmem:[%s1687_s4 + $0x8] sm:$0xff]   ;;  %v1374_v5 = vld [vmem:[%s1688_s0 + $0x10] sm:$0xff]   ;;  %v1416_v42 = vmov 0   ;;  %vm881_vm2 = vcmask 523264  }
   0x2   :  { %1189 = vmatprep.subr.bf16.mxu0 %v1369_v0  ;;  %v1371_v2 = vld [vmem:[%s1688_s0] sm:$0xff]   ;;  %v1372_v4 = vld [vmem:[%s1688_s0 + $0x8] sm:$0xff]   ;;  %v1375_v7 = vld [vmem:[%s1688_s0 + $0x18] sm:$0xff]   ;;  %1368 = vset.pattern.permute.xlu0 %v1416_v42 }
   0x3   :  { %1190 = vmatpush3.bf16.msra.mxu0 %v1369_v0  ;;  %1193 = vmatprep.mubr.msk.bf16.mxu0 %vm122_vm0, %v1371_v2  ;;  %v1373_v3 = vld [vmem:[%s1687_s4 + $0x20] sm:$0xff]   ;;  %v1378_v6 = vld [vmem:[%s1687_s4 + $0x28] sm:$0xff]   ;;  %v1383_v8 = vld [vmem:[%s1687_s4 + $0x30] sm:$0xff]  }
   0x4   :  { %1191 = vmatprep.subr.bf16.mxu0 %v1370_v1  ;;  %v1376_v9 = vld [vmem:[%s1688_s0 + $0x20] sm:$0xff]   ;;  %v1389_v10 = vld [vmem:[%s1687_s4 + $0x10] sm:$0xff]   ;;  %v1377_v11 = vld [vmem:[%s1688_s0 + $0x28] sm:$0xff]  }
   0x5   :  { %v1379_v12 = vld [vmem:[%s1688_s0 + $0x30] sm:$0xff]   ;;  %1169 = vmatprep.subr.bf16.mxu1 %v1389_v10  ;;  %v1392_v13 = vld [vmem:[%s1687_s4 + $0x18] sm:$0xff]   ;;  %v1393_v14 = vld [vmem:[%s1690_s1] sm:$0xff]  }
   0x6   :  { %1170 = vmatpush3.bf16.msra.mxu1 %v1389_v10  ;;  %1173 = vmatprep.mubr.msk.bf16.mxu1 %vm122_vm0, %v1393_v14  ;;  %v1394_v15 = vld [vmem:[%s1690_s1 + $0x8] sm:$0xff]   ;;  %v1397_v16 = vld [vmem:[%s1690_s1 + $0x10] sm:$0xff]   ;;  %v1380_v17 = vld [vmem:[%s1688_s0 + $0x38] sm:$0xff]  }
   0x7   :  { %1192 = vmatpush3.bf16.msra.mxu0 %v1370_v1  ;;  %1171 = vmatprep.subr.bf16.mxu1 %v1392_v13  ;;  %v1381_v18 = vld [vmem:[%s1689_s2] sm:$0xff]   ;;  %v1399_v19 = vld [vmem:[%s1690_s1 + $0x18] sm:$0xff]   ;;  %v1382_v21 = vld [vmem:[%s1689_s2 + $0x8] sm:$0xff]  }
   0x8   :  { %1209 = vmatprep.subr.bf16.mxu0 %v1373_v3  ;;  %v1401_v20 = vld [vmem:[%s1690_s1 + $0x20] sm:$0xff]   ;;  %v1384_v22 = vld [vmem:[%s1689_s2 + $0x10] sm:$0xff]   ;;  %v1388_v23 = vld [vmem:[%s1687_s4 + $0x38] sm:$0xff]  }
   0x9   :  { %v1403_v24 = vld [vmem:[%s1690_s1 + $0x28] sm:$0xff]   ;;  %v1405_v25 = vld [vmem:[%s1690_s1 + $0x30] sm:$0xff]   ;;  %v1385_v26 = vld [vmem:[%s1689_s2 + $0x18] sm:$0xff]  }
   0xa   :  { %1194 = vmatmul.mubr.msk.bf16.vlgmr.msra.gmra.mrb[0].mxu0 %vm122_vm0, %v1372_v4  ;;  %1172 = vmatpush3.bf16.msra.mxu1 %v1392_v13  ;;  %v1386_v27 = vld [vmem:[%s1689_s2 + $0x20] sm:$0xff]   ;;  %v1407_v28 = vld [vmem:[%s1690_s1 + $0x38] sm:$0xff]   ;;  %v1387_v29 = vld [vmem:[%s1689_s2 + $0x28] sm:$0xff]  }
   0xb   :  { %1210 = vmatpush3.bf16.msra.mxu0 %v1373_v3  ;;  %1197 = vmatprep.mubr.msk.bf16.mxu0 %vm122_vm0, %v1374_v5  ;;  %v1390_v30 = vld [vmem:[%s1689_s2 + $0x30] sm:$0xff]   ;;  %v1391_v31 = vld [vmem:[%s1689_s2 + $0x38] sm:$0xff]   ;;  %v1395_v32 = vld [vmem:[%s1691_s3] sm:$0xff]  }
   0xc   :  { %1211 = vmatprep.subr.bf16.mxu0 %v1378_v6  ;;  %v1396_v33 = vld [vmem:[%s1691_s3 + $0x8] sm:$0xff]   ;;  %v1398_v34 = vld [vmem:[%s1691_s3 + $0x10] sm:$0xff]   ;;  %v1400_v35 = vld [vmem:[%s1691_s3 + $0x18] sm:$0xff]   ;;  %1284 = vmatprep.subr.bf16.mxu1 %v1413_v40 }
   0xd   :  { %1174 = vmatmul.mubr.msk.bf16.vlgmr.msra.gmra.mrb[0].mxu1 %vm122_vm0, %v1394_v15  ;;  %v1402_v36 = vld [vmem:[%s1691_s3 + $0x20] sm:$0xff]   ;;  %v1404_v37 = vld [vmem:[%s1691_s3 + $0x28] sm:$0xff]   ;;  %v1406_v38 = vld [vmem:[%s1691_s3 + $0x30] sm:$0xff]  }
   0xe   :  { %1177 = vmatprep.mubr.msk.bf16.mxu1 %vm122_vm0, %v1397_v16  ;;  %v1408_v39 = vld [vmem:[%s1691_s3 + $0x38] sm:$0xff]   ;;  %v875_v43 = vld [vmem:[%s1692_s7] sm:$0xf]  ;;  %vm1637_vm3 = vmpackc.low %vm881_vm2, %vm881_vm2 }
   0xf   :  { %1212 = vmatpush3.bf16.msra.mxu0 %v1378_v6  ;;  %878 = vperm.xlu0 %1368, %v875_v43   ;;  %v1629_v61 = vld [vmem:[%s1693_s5] ss:$0 sm:$0xff] }
  0x10   :  { %1229 = vmatprep.subr.bf16.mxu0 %v1383_v8 }
  0x12   :  { %1198 = vmatmul.mubr.msk.bf16.gmra.mrb[4].mxu0 %vm122_vm0, %v1375_v7 }
  0x13   :  { %1201 = vmatprep.mubr.msk.bf16.mxu0 %vm122_vm0, %v1376_v9 }
  0x15   :  { %1178 = vmatmul.mubr.msk.bf16.gmra.mrb[4].mxu1 %vm122_vm0, %v1399_v19 }
  0x16   :  { %1181 = vmatprep.mubr.msk.bf16.mxu1 %vm122_vm0, %v1401_v20 }
  0x1a   :  { %1202 = vmatmul.mubr.msk.bf16.gmra.mrb[8].mxu0 %vm122_vm0, %v1377_v11 }
  0x1b   :  { %1205 = vmatprep.mubr.msk.bf16.mxu0 %vm122_vm0, %v1379_v12 }
  0x1d   :  { %1182 = vmatmul.mubr.msk.bf16.gmra.mrb[8].mxu1 %vm122_vm0, %v1403_v24 }
  0x1e   :  { %1185 = vmatprep.mubr.msk.bf16.mxu1 %vm122_vm0, %v1405_v25 }
  0x22   :  { %1206 = vmatmul.mubr.msk.bf16.gmra.mrb[12].mxu0 %vm122_vm0, %v1380_v17 }
  0x23   :  { %1213 = vmatprep.mubr.msk.bf16.mxu0 %vm122_vm0, %v1381_v18 }
  0x25   :  { %1186 = vmatmul.mubr.msk.bf16.gmra.mrb[12].mxu1 %vm122_vm0, %v1407_v28 }
  0x26   :  { %1281 = vmatprep.mubr.msk.f32.mxu1 %vm1414_vm1, %v1415_v41 }
  0x2a   :  { %1214 = vmatmul.mubr.msk.bf16.vlgmr.msra.gmra.mrb[0].mxu0 %vm122_vm0, %v1382_v21 }
  0x2b   :  { %1230 = vmatpush3.bf16.msra.mxu0 %v1383_v8  ;;  %1217 = vmatprep.mubr.msk.bf16.mxu0 %vm122_vm0, %v1384_v22 }
  0x2c   :  { %1231 = vmatprep.subr.bf16.mxu0 %v1388_v23 }
  0x2f   :  { %1232 = vmatpush3.bf16.msra.mxu0 %v1388_v23 }
  0x32   :  { %1218 = vmatmul.mubr.msk.bf16.gmra.mrb[4].mxu0 %vm122_vm0, %v1385_v26 }
  0x33   :  { %1221 = vmatprep.mubr.msk.bf16.mxu0 %vm122_vm0, %v1386_v27 }
  0x3a   :  { %1222 = vmatmul.mubr.msk.bf16.gmra.mrb[8].mxu0 %vm122_vm0, %v1387_v29 }
  0x3b   :  { %1225 = vmatprep.mubr.msk.bf16.mxu0 %vm122_vm0, %v1390_v30 }
  0x42   :  { %1226 = vmatmul.mubr.msk.bf16.gmra.mrb[12].mxu0 %vm122_vm0, %v1391_v31 }
  0x43   :  { %1233 = vmatprep.mubr.msk.bf16.mxu0 %vm122_vm0, %v1395_v32 }
  0x4a   :  { %1234 = vmatmul.mubr.msk.bf16.vlgmr.msra.gmra.mrb[0].mxu0 %vm122_vm0, %v1396_v33 }
  0x4b   :  { %1237 = vmatprep.mubr.msk.bf16.mxu0 %vm122_vm0, %v1398_v34 }
  0x52   :  { %1238 = vmatmul.mubr.msk.bf16.gmra.mrb[4].mxu0 %vm122_vm0, %v1400_v35 }
  0x53   :  { %1241 = vmatprep.mubr.msk.bf16.mxu0 %vm122_vm0, %v1402_v36 }
  0x5a   :  { %1242 = vmatmul.mubr.msk.bf16.gmra.mrb[8].mxu0 %vm122_vm0, %v1404_v37 }
  0x5b   :  { %1245 = vmatprep.mubr.msk.bf16.mxu0 %vm122_vm0, %v1406_v38 }
  0x62   :  { %1246 = vmatmul.mubr.msk.bf16.gmra.mrb[12].mxu0 %vm122_vm0, %v1408_v39 }
  0xe0   :  { %v1175_v44 = vpop.f32.mrb[0].mxu1 }
  0xe1   :  { %v181_v45 = vpop.f32.mrb[1].mxu1 }
  0xe2   :  { %v1176_v46 = vpop.f32.mrb[2].mxu1 }
  0xe3   :  { %v184_v47 = vpop.f32.mrb[3].mxu1 }
  0xe8   :  { %v1179_v48 = vpop.f32.mrb[4].mxu1 }
  0xe9   :  { %v197_v49 = vpop.f32.mrb[5].mxu1 }
  0xea   :  { %v1180_v50 = vpop.f32.mrb[6].mxu1 }
  0xeb   :  { %v200_v51 = vpop.f32.mrb[7].mxu1 }
  0xf0   :  { %v1183_v52 = vpop.f32.mrb[8].mxu1 }
  0xf1   :  { %v213_v53 = vpop.f32.mrb[9].mxu1 }
  0xf2   :  { %v1184_v54 = vpop.f32.mrb[10].mxu1 }
  0xf3   :  { %v216_v55 = vpop.f32.mrb[11].mxu1 }
  0xf8   :  { %v1618_v56 = vpop.f32.mrb[12].mxu1 }
  0xf9   :  { %v1620_v57 = vpop.f32.mrb[13].mxu1 }
  0xfa   :  { %v1622_v58 = vpop.f32.mrb[14].mxu1 }
  0xfb   :  { %v1624_v59 = vpop.f32.mrb[15].mxu1 }
 0x11d   :  { %v1235_v60 = vpop.f32.mrb[0].mxu0 }
 0x11e   :  { %v1316_v62 = vadd.f32 %v1235_v60, %v1175_v44  ;;  %v756_v63 = vpop.f32.mrb[1].mxu0 }
 0x11f   :  { %v1317_v0 = vadd.f32 %v756_v63, %v181_v45  ;;  %v1236_v1 = vpop.f32.mrb[2].mxu0 }
 0x120   :  { %v844_v2 = vadd.f32 %v1316_v62, %v1629_v61  ;;  %v1318_v3 = vadd.f32 %v1236_v1, %v1176_v46  ;;  %v759_v4 = vpop.f32.mrb[3].mxu0 }
 0x121   :  { %v842_v5 = vadd.f32 %v1317_v0, %v1629_v61  ;;  %v1319_v6 = vadd.f32 %v759_v4, %v184_v47 }
 0x122   :  { %v845_v7 = vadd.f32 %v1318_v3, %v1629_v61  ;;  %v860_v9 = vmax.f32 %v844_v2, 0.0 }
 0x123   :  { %v843_v8 = vadd.f32 %v1319_v6, %v1629_v61  ;;  %v858_v11 = vmax.f32 %v842_v5, 0.0 }
 0x124   :  { %v861_v10 = vmax.f32 %v845_v7, 0.0 }
 0x125   :  { %v859_v12 = vmax.f32 %v843_v8, 0.0  ;;  %v1239_v13 = vpop.f32.mrb[4].mxu0 }
 0x126   :  { %v1289_v14 = vpack.c.bf16 %v861_v10, %v860_v9  ;;  %v1320_v15 = vadd.f32 %v1239_v13, %v1179_v48  ;;  %v772_v16 = vpop.f32.mrb[5].mxu0 }
 0x127   :  { %v1285_v18 = vpack.c.bf16 %v859_v12, %v858_v11  ;;  %v1321_v19 = vadd.f32 %v772_v16, %v197_v49  ;;  %v1240_v20 = vpop.f32.mrb[6].mxu0 }
 0x128   :  { %v848_v21 = vadd.f32 %v1320_v15, %v1629_v61  ;;  %v1322_v22 = vadd.f32 %v1240_v20, %v1180_v50  ;;  %v775_v23 = vpop.f32.mrb[7].mxu0  ;;  %v1011_v15 = vlaneseq }
 0x129   :  { %v846_v24 = vadd.f32 %v1321_v19, %v1629_v61  ;;  %v1323_v25 = vadd.f32 %v775_v23, %v200_v51  ;;  %1287 = vmatpush3.bf16.xpose.msk.msra.mxu1 %vm1637_vm3, %v1285_v18 }
 0x12a   :  { %v849_v26 = vadd.f32 %v1322_v22, %v1629_v61  ;;  %1288 = vmatprep.subr.bf16.mxu1 %v1413_v40  ;;  %v864_v28 = vmax.f32 %v848_v21, 0.0 }
 0x12b   :  { %v847_v27 = vadd.f32 %v1323_v25, %v1629_v61  ;;  %v862_v30 = vmax.f32 %v846_v24, 0.0 }
 0x12c   :  { %v865_v29 = vmax.f32 %v849_v26, 0.0 }
 0x12d   :  { %v863_v31 = vmax.f32 %v847_v27, 0.0  ;;  %v1243_v32 = vpop.f32.mrb[8].mxu0 }
 0x12e   :  { %v1297_v33 = vpack.c.bf16 %v865_v29, %v864_v28  ;;  %v1324_v34 = vadd.f32 %v1243_v32, %v1183_v52  ;;  %v788_v35 = vpop.f32.mrb[9].mxu0 }
 0x12f   :  { %v1293_v36 = vpack.c.bf16 %v863_v31, %v862_v30  ;;  %v1325_v37 = vadd.f32 %v788_v35, %v213_v53  ;;  %v1244_v38 = vpop.f32.mrb[10].mxu0 }
 0x130   :  { %v852_v39 = vadd.f32 %v1324_v34, %v1629_v61  ;;  %v1326_v41 = vadd.f32 %v1244_v38, %v1184_v54  ;;  %v791_v42 = vpop.f32.mrb[11].mxu0 }
 0x131   :  { %v850_v43 = vadd.f32 %v1325_v37, %v1629_v61  ;;  %v1327_v44 = vadd.f32 %v791_v42, %v216_v55  ;;  %1291 = vmatpush3.bf16.xpose.msk.msra.mxu1 %vm1637_vm3, %v1289_v14 }
 0x132   :  { %v853_v45 = vadd.f32 %v1326_v41, %v1629_v61  ;;  %1292 = vmatprep.subr.bf16.mxu1 %v1413_v40  ;;  %v868_v47 = vmax.f32 %v852_v39, 0.0 }
 0x133   :  { %v851_v46 = vadd.f32 %v1327_v44, %v1629_v61  ;;  %v866_v49 = vmax.f32 %v850_v43, 0.0 }
 0x134   :  { %v869_v48 = vmax.f32 %v853_v45, 0.0 }
 0x135   :  { %v867_v50 = vmax.f32 %v851_v46, 0.0  ;;  %v1247_v51 = vpop.f32.mrb[12].mxu0 }
 0x136   :  { %v1305_v52 = vpack.c.bf16 %v869_v48, %v868_v47  ;;  %v1328_v53 = vadd.f32 %v1247_v51, %v1618_v56  ;;  %v804_v54 = vpop.f32.mrb[13].mxu0 }
 0x137   :  { %v1301_v60 = vpack.c.bf16 %v867_v50, %v866_v49  ;;  %v1329_v55 = vadd.f32 %v804_v54, %v1620_v57  ;;  %v1248_v62 = vpop.f32.mrb[14].mxu0 }
 0x138   :  { %v856_v63 = vadd.f32 %v1328_v53, %v1629_v61  ;;  %v1330_v0 = vadd.f32 %v1248_v62, %v1622_v58  ;;  %v807_v1 = vpop.f32.mrb[15].mxu0 }
 0x139   :  { %v854_v2 = vadd.f32 %v1329_v55, %v1629_v61  ;;  %v1331_v3 = vadd.f32 %v807_v1, %v1624_v59  ;;  %1295 = vmatpush3.bf16.xpose.msk.msra.mxu1 %vm1637_vm3, %v1293_v36  ;;  %v874_v59 = vld [vmem:[%s1694_s6] sm:$0xf] }
 0x13a   :  { %v857_v4 = vadd.f32 %v1330_v0, %v1629_v61  ;;  %1296 = vmatprep.subr.bf16.mxu1 %v1413_v40  ;;  %v872_v57 = vmax.f32 %v856_v63, 0.0 }
 0x13b   :  { %v855_v56 = vadd.f32 %v1331_v3, %v1629_v61  ;;  %v870_v6 = vmax.f32 %v854_v2, 0.0  ;;  %v879_v61 = vpop.permute.xlu0 %878 }
 0x13c   :  { %v873_v5 = vmax.f32 %v857_v4, 0.0 }
 0x13d   :  { %v871_v7 = vmax.f32 %v855_v56, 0.0 }
 0x13e   :  { %v1313_v8 = vpack.c.bf16 %v873_v5, %v872_v57 }
 0x13f   :  { %v1309_v58 = vpack.c.bf16 %v871_v7, %v870_v6 }
 0x141   :  { %1299 = vmatpush3.bf16.xpose.msk.msra.mxu1 %vm1637_vm3, %v1297_v33 }
 0x142   :  { %1300 = vmatprep.subr.bf16.mxu1 %v1413_v40 }
 0x149   :  { %1303 = vmatpush3.bf16.xpose.msk.msra.mxu1 %vm1637_vm3, %v1301_v60 }
 0x14a   :  { %1304 = vmatprep.subr.bf16.mxu1 %v1413_v40 }
 0x151   :  { %1307 = vmatpush3.bf16.xpose.msk.msra.mxu1 %vm1637_vm3, %v1305_v52 }
 0x152   :  { %1308 = vmatprep.subr.bf16.mxu1 %v1413_v40 }
 0x159   :  { %1311 = vmatpush3.bf16.xpose.msk.msra.mxu1 %vm1637_vm3, %v1309_v58 }
 0x15a   :  { %1312 = vmatprep.subr.bf16.mxu1 %v1413_v40  ;;  %v1012_v40 = vshrl.u32 %v1011_v15, 7 }
 0x15c   :  { %vm1013_vm4 = vcmp.eq.s32.totalorder %v1012_v40, 0 }
 0x161   :  { %1315 = vmatpush3.bf16.xpose.msk.msra.mxu1 %vm1637_vm3, %v1313_v8 }
 0x168   :  { %1282 = vmatmul.mubr.msk.f32.vlgmr.msra.gmra.mrb[16].mxu1 %vm881_vm2, %v874_v59 }
 0x23b   :  { %v999_v9 = vpop.f32.mrb[16].mxu1 }
 0x23c   :  { %v1000_v10 = vadd.f32 %v999_v9, %v879_v61  ;;  %v1283_v11 = vpop.f32.mrb[17].mxu1 }
 0x23e   :  { %v1110_v12 = vmul.f32 -1.442695, %v1000_v10 }
 0x240   :  { %1409 = vpow2.f32 %v1110_v12 }
 0x24a   :  { %v1410_v13 = vpop.eup %1409 }
 0x24b   :  { %v1006_v14 = vadd.f32 1.0, %v1410_v13 }
 0x24d   :  { %1411 = vrcp.f32 %v1006_v14 }
 0x257   :  { %v1412_v16 = vpop.eup %1411 }
 0x258   :  { %v1009_v17 = vmul.f32 1.002, %v1412_v16 }
 0x25a   :  { %v1111_v18 = vadd.f32 -0.001, %v1009_v17 }
 0x25c   :  { %v1014_v19 = vsel %vm1013_vm4, %v1000_v10, %v1111_v18 }
 0x25d   :  { %1015 = vst [vmem:[%s1695_s8] sm:$0xf] %v1014_v19 }

</bundles_post_ra>
